<compile_context>
chip_gen: v7x
topology: tpu7x:2x2x1
jax: 0.10.0
libtpu: 0.0.40
codegen_flags: <defaults>
</compile_context>

<pallas_src>
import functools
import math

import jax
import jax.numpy as jnp
from jax.experimental import pallas as pl
from jax.experimental.pallas import tpu as pltpu


# ---------------------------------------------------------------------------
# Pallas kernel: whole encoder layer for one batch element. Refs are (S, D).
# ---------------------------------------------------------------------------
def _encoder_layer_kernel(
    src_ref, pos_ref,
    wqk_ref, bqk_ref, wv_ref, bv_ref,
    wo_ref, bo_ref,
    w1_ref, b1_ref, w2_ref, b2_ref,
    g1_ref, beta1_ref, g2_ref, beta2_ref,
    out_ref,
    *, nhead: int, kv_tile: int,
):
    src = src_ref[...]                        # (S, D), input dtype
    S, D = src.shape
    hd = D // nhead
    cdt = wqk_ref.dtype                       # MXU operand dtype (bf16 if requested)

    # ---- fused Q|K projection (1/sqrt(hd) folded into the Q half), V projection ----
    qk_in = (src + pos_ref[...]).astype(cdt)                          # with_pos_embed
    qk = jnp.dot(qk_in, wqk_ref[...], preferred_element_type=jnp.float32)
    qk = qk + bqk_ref[...].astype(jnp.float32)                        # (S, 2D) f32
    v = jnp.dot(src.astype(cdt), wv_ref[...], preferred_element_type=jnp.float32)
    v = v + bv_ref[...].astype(jnp.float32)                           # (S, D)  f32

    # head-batched layout: (H, S, hd)
    q3 = jnp.transpose(qk[:, :D].astype(cdt).reshape(S, nhead, hd), (1, 0, 2))
    k3 = jnp.transpose(qk[:, D:].astype(cdt).reshape(S, nhead, hd), (1, 0, 2))
    v3 = jnp.transpose(v.astype(cdt).reshape(S, nhead, hd), (1, 0, 2))

    # ---- flash-style attention: online softmax over KV tiles (f32 statistics) ----
    nkv = S // kv_tile                        # wrapper guarantees divisibility

    def tile(t):
        lo = t * kv_tile
        k_t = k3[:, lo:lo + kv_tile, :]
        v_t = v3[:, lo:lo + kv_tile, :]
        s_t = jnp.einsum('hqd,hkd->hqk', q3, k_t,
                         preferred_element_type=jnp.float32)          # (H, S, TK)
        return s_t, v_t

    s0, v0 = tile(0)
    m = jnp.max(s0, axis=-1, keepdims=True)                           # (H, S, 1)
    p = jnp.exp(s0 - m)
    l = jnp.sum(p, axis=-1, keepdims=True)
    acc = jnp.einsum('hqk,hkd->hqd', p.astype(cdt), v0,
                     preferred_element_type=jnp.float32)              # (H, S, hd) f32
    for t in range(1, nkv):                                           # static unroll
        s_t, v_t = tile(t)
        m_new = jnp.maximum(m, jnp.max(s_t, axis=-1, keepdims=True))
        alpha = jnp.exp(m - m_new)
        p = jnp.exp(s_t - m_new)
        l = alpha * l + jnp.sum(p, axis=-1, keepdims=True)
        acc = alpha * acc + jnp.einsum('hqk,hkd->hqd', p.astype(cdt), v_t,
                                       preferred_element_type=jnp.float32)
        m = m_new

    o = acc * pl.reciprocal(l, approx=True)                           # (H, S, hd) f32

    # ---- output projection: heads concatenated back, single (S,D)@(D,D) GEMM ----
    o_sd = jnp.transpose(o.astype(cdt), (1, 0, 2)).reshape(S, D)
    attn = jnp.dot(o_sd, wo_ref[...], preferred_element_type=jnp.float32)
    attn = attn + bo_ref[...].astype(jnp.float32)

    # ---- residual + LayerNorm 1 (f32 statistics) ----
    x = src.astype(jnp.float32) + attn                                # dropout1 = identity
    mu = jnp.mean(x, axis=-1, keepdims=True)
    var = jnp.mean((x - mu) ** 2, axis=-1, keepdims=True)
    x = (x - mu) * jax.lax.rsqrt(var + 1e-5)
    x = x * g1_ref[...].astype(jnp.float32) + beta1_ref[...].astype(jnp.float32)

    # ---- feed-forward: linear1 -> relu -> linear2 ----
    h1 = jnp.dot(x.astype(cdt), w1_ref[...], preferred_element_type=jnp.float32)
    h1 = jnp.maximum(h1 + b1_ref[...].astype(jnp.float32), 0.0)       # relu; dropout = id
    h2 = jnp.dot(h1.astype(cdt), w2_ref[...], preferred_element_type=jnp.float32)
    h2 = h2 + b2_ref[...].astype(jnp.float32)

    # ---- residual + LayerNorm 2 ----
    y = x + h2                                                        # dropout2 = identity
    mu = jnp.mean(y, axis=-1, keepdims=True)
    var = jnp.mean((y - mu) ** 2, axis=-1, keepdims=True)
    y = (y - mu) * jax.lax.rsqrt(var + 1e-5)
    y = y * g2_ref[...].astype(jnp.float32) + beta2_ref[...].astype(jnp.float32)

    out_ref[...] = y.astype(out_ref.dtype)


# ---------------------------------------------------------------------------
# Wrapper
# ---------------------------------------------------------------------------
def _largest_divisor_leq(n, cap):
    t = max(1, min(n, cap))
    while n % t:
        t -= 1
    return t


def _const_index_map(ndim):
    def idx(b):
        return (0,) * ndim
    return idx


def _default_vmem_limit_bytes():
    # Generation-aware scoped-VMEM budget: ~85% of physical per-core VMEM
    # (≈54 MiB on v7x, ≈108 MiB on v5e/v6e).  Falls back to compiler default.
    try:
        cap = pltpu.get_tpu_info().vmem_capacity_bytes
        return int(cap * 0.85)
    except Exception:
        return None


def transformer_encoder_layer(src, pos, params, *, nhead, kv_tile=None,
                              compute_dtype=None, batch_first=False):
    """forward_post of TransformerEncoderLayer (eval mode, no masks).

    src/pos: (S, B, D) PyTorch layout, or (B, S, D) if batch_first=True
    compute_dtype: e.g. jnp.bfloat16 to run all MXU operands in bf16 (f32 accum).
    """
    if batch_first:
        B, S, D = src.shape
        src_b, pos_b = src, pos
    else:
        S, B, D = src.shape
        # One-time layout change so the kernel streams contiguous (S, D) slabs.
        # Pre-transpose outside a layer stack to amortize over all layers.
        src_b = jnp.transpose(src, (1, 0, 2))
        pos_b = jnp.transpose(pos, (1, 0, 2))

    hd = D // nhead
    scale = 1.0 / math.sqrt(hd)
    kv_tile = _largest_divisor_leq(S, kv_tile if kv_tile is not None else 512)

    cast = (lambda a: a.astype(compute_dtype)) if compute_dtype is not None else (lambda a: a)

    # Fuse Q|K weights with the softmax scale folded into the Q half.
    w_qk = jnp.concatenate([params["wq"] * scale, params["wk"]], axis=1)   # (D, 2D)
    b_qk = jnp.concatenate([params["bq"] * scale, params["bk"]], axis=1)   # (1, 2D)

    weights = (
        cast(w_qk), b_qk, cast(params["wv"]), params["bv"],
        cast(params["wo"]), params["bo"],
        cast(params["w1"]), params["b1"], cast(params["w2"]), params["b2"],
        params["gamma1"], params["beta1"], params["gamma2"], params["beta2"],
    )

    act_spec = pl.BlockSpec((None, S, D), lambda b: (b, 0, 0))
    weight_specs = [pl.BlockSpec(w.shape, _const_index_map(w.ndim)) for w in weights]

    kernel = functools.partial(_encoder_layer_kernel, nhead=nhead, kv_tile=kv_tile)

    cp_kwargs = dict(dimension_semantics=("parallel",))
    vlim = _default_vmem_limit_bytes()
    if vlim is not None:
        cp_kwargs["vmem_limit_bytes"] = vlim

    out_b = pl.pallas_call(
        kernel,
        out_shape=jax.ShapeDtypeStruct((B, S, D), src.dtype),
        grid_spec=pltpu.PrefetchScalarGridSpec(
            num_scalar_prefetch=0,
            grid=(B,),
            in_specs=[act_spec, act_spec] + weight_specs,
            out_specs=pl.BlockSpec((None, S, D), lambda b: (b, 0, 0)),
        ),
        compiler_params=pltpu.CompilerParams(**cp_kwargs),
    )(src_b, pos_b, *weights)

    if batch_first:
        return out_b
    return jnp.transpose(out_b, (1, 0, 2))


# ---------------------------------------------------------------------------
# Pure-JAX reference (mirrors torch semantics) for a correctness check.
# ---------------------------------------------------------------------------
def reference(src, pos, params, *, nhead):
    S, B, D = src.shape
    hd = D // nhead
    qk_in = src + pos
    q = qk_in @ params["wq"] + params["bq"][0]
    k = qk_in @ params["wk"] + params["bk"][0]
    v = src @ params["wv"] + params["bv"][0]

    def split(t):  # (S, B, D) -> (B, nhead, S, hd)
        return jnp.transpose(t.reshape(S, B, nhead, hd), (1, 2, 0, 3))

    qh, kh, vh = split(q) / math.sqrt(hd), split(k), split(v)
    scores = jnp.einsum("bhqd,bhkd->bhqk", qh, kh)
    p = jax.nn.softmax(scores, axis=-1)
    o = jnp.einsum("bhqk,bhkd->bhqd", p, vh)            # (B, H, S, hd)
    o = jnp.transpose(o, (2, 0, 1, 3)).reshape(S, B, D)
    attn = o @ params["wo"] + params["bo"][0]

    def ln(x, g, b):
        mu = x.mean(-1, keepdims=True)
        var = ((x - mu) ** 2).mean(-1, keepdims=True)
        return (x - mu) * jax.lax.rsqrt(var + 1e-5) * g[0] + b[0]

    x = ln(src + attn, params["gamma1"], params["beta1"])
    h = jnp.maximum(x @ params["w1"] + params["b1"][0], 0.0)
    y = ln(x + h @ params["w2"] + params["b2"][0], params["gamma2"], params["beta2"])
    return y


# ---------------------------------------------------------------------------
if __name__ == "__main__":
    S, B, D = 8, 2, 32          # seq, batch, d_model
    NHEAD = 4
    F_DIM = 64                  # dim_feedforward (small for test)

    key = jax.random.PRNGKey(0)
    keys = jax.random.split(key, 16)

    def w(k, shape, scale=0.1):
        return (scale * jax.random.normal(k, shape)).astype(jnp.float32)

    # Weights stored already transposed so the kernel computes x @ W + b
    # (torch Linear is x @ W.T + b with W of shape (out, in)).
    params = dict(
        wq=w(keys[0], (D, D)), bq=w(keys[1], (1, D)),
        wk=w(keys[2], (D, D)), bk=w(keys[3], (1, D)),
        wv=w(keys[4], (D, D)), bv=w(keys[5], (1, D)),
        wo=w(keys[6], (D, D)), bo=w(keys[7], (1, D)),
        w1=w(keys[8], (D, F_DIM)), b1=w(keys[9], (1, F_DIM)),
        w2=w(keys[10], (F_DIM, D)), b2=w(keys[11], (1, D)),
        gamma1=jnp.ones((1, D), jnp.float32), beta1=jnp.zeros((1, D), jnp.float32),
        gamma2=jnp.ones((1, D), jnp.float32), beta2=jnp.zeros((1, D), jnp.float32),
    )

    src = w(keys[12], (S, B, D), scale=1.0)
    pos = w(keys[13], (S, B, D), scale=1.0)

    # kv_tile=4 -> two KV tiles, so the online-softmax (flash) path is exercised.
    out = transformer_encoder_layer(src, pos, params, nhead=NHEAD, kv_tile=4)
    out = jax.block_until_ready(out)

    ref = reference(src, pos, params, nhead=NHEAD)
    assert out.shape == (S, B, D)
    # Tolerance 1e-3: outputs are layer-normed O(1); the approx (EUP) reciprocal in the
    # softmax normalization perturbs low-order bits relative to the exact reference.
    err = float(jnp.abs(out - ref).max())
    assert jnp.allclose(out, ref, atol=1e-3, rtol=1e-3), err

    print("KERNEL_OK")
</pallas_src>

<mosaic_0001>
module attributes {stable_mosaic.version = 11 : i64} {
  func.func @_encoder_layer_kernel(%arg0: i32, %arg1: memref<1x8x32xf32, #tpu.memory_space<vmem>>, %arg2: memref<1x8x32xf32, #tpu.memory_space<vmem>>, %arg3: memref<32x64xf32, #tpu.memory_space<vmem>>, %arg4: memref<1x64xf32, #tpu.memory_space<vmem>>, %arg5: memref<32x32xf32, #tpu.memory_space<vmem>>, %arg6: memref<1x32xf32, #tpu.memory_space<vmem>>, %arg7: memref<32x32xf32, #tpu.memory_space<vmem>>, %arg8: memref<1x32xf32, #tpu.memory_space<vmem>>, %arg9: memref<32x64xf32, #tpu.memory_space<vmem>>, %arg10: memref<1x64xf32, #tpu.memory_space<vmem>>, %arg11: memref<64x32xf32, #tpu.memory_space<vmem>>, %arg12: memref<1x32xf32, #tpu.memory_space<vmem>>, %arg13: memref<1x32xf32, #tpu.memory_space<vmem>>, %arg14: memref<1x32xf32, #tpu.memory_space<vmem>>, %arg15: memref<1x32xf32, #tpu.memory_space<vmem>>, %arg16: memref<1x32xf32, #tpu.memory_space<vmem>>, %arg17: memref<1x8x32xf32, #tpu.memory_space<vmem>>) attributes {dimension_semantics = [#tpu.dimension_semantics<parallel>], iteration_bounds = array<i64: 2>, scalar_prefetch = 0 : i64, scratch_operands = 0 : i64, tpu.core_type = #tpu.core_type<tc>, window_params = [{transform_indices = @transform_0, window_bounds = array<i64: 1, 8, 32>}, {transform_indices = @transform_1, window_bounds = array<i64: 1, 8, 32>}, {pipeline_mode = #tpu.pipeline_mode<synchronous>, transform_indices = @transform_2, window_bounds = array<i64: 32, 64>}, {pipeline_mode = #tpu.pipeline_mode<synchronous>, transform_indices = @transform_3, window_bounds = array<i64: 1, 64>}, {pipeline_mode = #tpu.pipeline_mode<synchronous>, transform_indices = @transform_4, window_bounds = array<i64: 32, 32>}, {pipeline_mode = #tpu.pipeline_mode<synchronous>, transform_indices = @transform_5, window_bounds = array<i64: 1, 32>}, {pipeline_mode = #tpu.pipeline_mode<synchronous>, transform_indices = @transform_6, window_bounds = array<i64: 32, 32>}, {pipeline_mode = #tpu.pipeline_mode<synchronous>, transform_indices = @transform_7, window_bounds = array<i64: 1, 32>}, {pipeline_mode = #tpu.pipeline_mode<synchronous>, transform_indices = @transform_8, window_bounds = array<i64: 32, 64>}, {pipeline_mode = #tpu.pipeline_mode<synchronous>, transform_indices = @transform_9, window_bounds = array<i64: 1, 64>}, {pipeline_mode = #tpu.pipeline_mode<synchronous>, transform_indices = @transform_10, window_bounds = array<i64: 64, 32>}, {pipeline_mode = #tpu.pipeline_mode<synchronous>, transform_indices = @transform_11, window_bounds = array<i64: 1, 32>}, {pipeline_mode = #tpu.pipeline_mode<synchronous>, transform_indices = @transform_12, window_bounds = array<i64: 1, 32>}, {pipeline_mode = #tpu.pipeline_mode<synchronous>, transform_indices = @transform_13, window_bounds = array<i64: 1, 32>}, {pipeline_mode = #tpu.pipeline_mode<synchronous>, transform_indices = @transform_14, window_bounds = array<i64: 1, 32>}, {pipeline_mode = #tpu.pipeline_mode<synchronous>, transform_indices = @transform_15, window_bounds = array<i64: 1, 32>}, {transform_indices = @transform_16, window_bounds = array<i64: 1, 8, 32>}]} {
    %c0 = arith.constant 0 : index
    %c0_0 = arith.constant 0 : index
    %c0_1 = arith.constant 0 : index
    %0 = vector.load %arg1[%c0, %c0_0, %c0_1] : memref<1x8x32xf32, #tpu.memory_space<vmem>>, vector<1x8x32xf32>
    %1 = vector.shape_cast %0 : vector<1x8x32xf32> to vector<8x32xf32>
    %c0_2 = arith.constant 0 : index
    %c0_3 = arith.constant 0 : index
    %c0_4 = arith.constant 0 : index
    %2 = vector.load %arg2[%c0_2, %c0_3, %c0_4] : memref<1x8x32xf32, #tpu.memory_space<vmem>>, vector<1x8x32xf32>
    %3 = vector.shape_cast %2 : vector<1x8x32xf32> to vector<8x32xf32>
    %4 = arith.addf %1, %3 : vector<8x32xf32>
    %c0_5 = arith.constant 0 : index
    %c0_6 = arith.constant 0 : index
    %5 = vector.load %arg3[%c0_5, %c0_6] : memref<32x64xf32, #tpu.memory_space<vmem>>, vector<32x64xf32>
    %cst = arith.constant dense<0.000000e+00> : vector<8x64xf32>
    %6 = tpu.matmul %4, %5, %cst {dimension_numbers = #tpu.dot_dimension_numbers<[1], [0], [0], [1], [0, 0, 1, 1], [], []>} : vector<8x32xf32>, vector<32x64xf32>, vector<8x64xf32> -> vector<8x64xf32>
    %c0_7 = arith.constant 0 : index
    %c0_8 = arith.constant 0 : index
    %7 = vector.load %arg4[%c0_7, %c0_8] : memref<1x64xf32, #tpu.memory_space<vmem>>, vector<1x64xf32>
    %8 = vector.broadcast %7 : vector<1x64xf32> to vector<8x64xf32>
    %9 = arith.addf %6, %8 : vector<8x64xf32>
    %c0_9 = arith.constant 0 : index
    %c0_10 = arith.constant 0 : index
    %10 = vector.load %arg5[%c0_9, %c0_10] : memref<32x32xf32, #tpu.memory_space<vmem>>, vector<32x32xf32>
    %cst_11 = arith.constant dense<0.000000e+00> : vector<8x32xf32>
    %11 = tpu.matmul %1, %10, %cst_11 {dimension_numbers = #tpu.dot_dimension_numbers<[1], [0], [0], [1], [0, 0, 1, 1], [], []>} : vector<8x32xf32>, vector<32x32xf32>, vector<8x32xf32> -> vector<8x32xf32>
    %c0_12 = arith.constant 0 : index
    %c0_13 = arith.constant 0 : index
    %12 = vector.load %arg6[%c0_12, %c0_13] : memref<1x32xf32, #tpu.memory_space<vmem>>, vector<1x32xf32>
    %13 = vector.broadcast %12 : vector<1x32xf32> to vector<8x32xf32>
    %14 = arith.addf %11, %13 : vector<8x32xf32>
    %15 = vector.extract_strided_slice %9 {offsets = [0, 0], sizes = [8, 32], strides = [1, 1]} : vector<8x64xf32> to vector<8x32xf32>
    %16 = vector.shape_cast %15 : vector<8x32xf32> to vector<8x4x8xf32>
    %17 = tpu.transpose %16, [1, 0, 2] : vector<8x4x8xf32> -> vector<4x8x8xf32>
    %18 = vector.extract_strided_slice %9 {offsets = [0, 32], sizes = [8, 32], strides = [1, 1]} : vector<8x64xf32> to vector<8x32xf32>
    %19 = vector.shape_cast %18 : vector<8x32xf32> to vector<8x4x8xf32>
    %20 = tpu.transpose %19, [1, 0, 2] : vector<8x4x8xf32> -> vector<4x8x8xf32>
    %21 = vector.shape_cast %14 : vector<8x32xf32> to vector<8x4x8xf32>
    %22 = tpu.transpose %21, [1, 0, 2] : vector<8x4x8xf32> -> vector<4x8x8xf32>
    %23 = vector.extract_strided_slice %20 {offsets = [0, 0, 0], sizes = [4, 4, 8], strides = [1, 1, 1]} : vector<4x8x8xf32> to vector<4x4x8xf32>
    %24 = vector.extract_strided_slice %22 {offsets = [0, 0, 0], sizes = [4, 4, 8], strides = [1, 1, 1]} : vector<4x8x8xf32> to vector<4x4x8xf32>
    "tpu.trace_start"() <{level = 10 : i32, message = "hqd,hkd->hqk"}> : () -> ()
    %cst_14 = arith.constant dense<0.000000e+00> : vector<4x8x4xf32>
    %25 = tpu.matmul %17, %23, %cst_14 {dimension_numbers = #tpu.dot_dimension_numbers<[2], [2], [1], [1], [0, 0, 0, 1, 1, 1], [0], [0]>} : vector<4x8x8xf32>, vector<4x4x8xf32>, vector<4x8x4xf32> -> vector<4x8x4xf32>
    "tpu.trace_stop"() : () -> ()
    %cst_15 = arith.constant dense<0xFF800000> : vector<4x8xf32>
    %26 = vector.multi_reduction <maximumf>, %25, %cst_15 [2] : vector<4x8x4xf32> to vector<4x8xf32>
    %27 = vector.shape_cast %26 : vector<4x8xf32> to vector<4x8x1xf32>
    %28 = vector.broadcast %27 : vector<4x8x1xf32> to vector<4x8x4xf32>
    %29 = arith.subf %25, %28 : vector<4x8x4xf32>
    %30 = math.exp %29 : vector<4x8x4xf32>
    %cst_16 = arith.constant dense<0.000000e+00> : vector<4x8xf32>
    %31 = vector.multi_reduction <add>, %30, %cst_16 [2] : vector<4x8x4xf32> to vector<4x8xf32>
    %32 = vector.shape_cast %31 : vector<4x8xf32> to vector<4x8x1xf32>
    "tpu.trace_start"() <{level = 10 : i32, message = "hqk,hkd->hqd"}> : () -> ()
    %cst_17 = arith.constant dense<0.000000e+00> : vector<4x8x8xf32>
    %33 = tpu.matmul %30, %24, %cst_17 {dimension_numbers = #tpu.dot_dimension_numbers<[2], [1], [1], [2], [0, 0, 0, 1, 1, 2], [0], [0]>} : vector<4x8x4xf32>, vector<4x4x8xf32>, vector<4x8x8xf32> -> vector<4x8x8xf32>
    "tpu.trace_stop"() : () -> ()
    %34 = vector.extract_strided_slice %20 {offsets = [0, 4, 0], sizes = [4, 4, 8], strides = [1, 1, 1]} : vector<4x8x8xf32> to vector<4x4x8xf32>
    %35 = vector.extract_strided_slice %22 {offsets = [0, 4, 0], sizes = [4, 4, 8], strides = [1, 1, 1]} : vector<4x8x8xf32> to vector<4x4x8xf32>
    "tpu.trace_start"() <{level = 10 : i32, message = "hqd,hkd->hqk"}> : () -> ()
    %cst_18 = arith.constant dense<0.000000e+00> : vector<4x8x4xf32>
    %36 = tpu.matmul %17, %34, %cst_18 {dimension_numbers = #tpu.dot_dimension_numbers<[2], [2], [1], [1], [0, 0, 0, 1, 1, 1], [0], [0]>} : vector<4x8x8xf32>, vector<4x4x8xf32>, vector<4x8x4xf32> -> vector<4x8x4xf32>
    "tpu.trace_stop"() : () -> ()
    %cst_19 = arith.constant dense<0xFF800000> : vector<4x8xf32>
    %37 = vector.multi_reduction <maximumf>, %36, %cst_19 [2] : vector<4x8x4xf32> to vector<4x8xf32>
    %38 = vector.shape_cast %37 : vector<4x8xf32> to vector<4x8x1xf32>
    %39 = arith.maximumf %27, %38 : vector<4x8x1xf32>
    %40 = arith.subf %27, %39 : vector<4x8x1xf32>
    %41 = math.exp %40 : vector<4x8x1xf32>
    %42 = vector.broadcast %39 : vector<4x8x1xf32> to vector<4x8x4xf32>
    %43 = arith.subf %36, %42 : vector<4x8x4xf32>
    %44 = math.exp %43 : vector<4x8x4xf32>
    %45 = arith.mulf %41, %32 : vector<4x8x1xf32>
    %cst_20 = arith.constant dense<0.000000e+00> : vector<4x8xf32>
    %46 = vector.multi_reduction <add>, %44, %cst_20 [2] : vector<4x8x4xf32> to vector<4x8xf32>
    %47 = vector.shape_cast %46 : vector<4x8xf32> to vector<4x8x1xf32>
    %48 = arith.addf %45, %47 : vector<4x8x1xf32>
    %49 = vector.broadcast %41 : vector<4x8x1xf32> to vector<4x8x8xf32>
    %50 = arith.mulf %49, %33 : vector<4x8x8xf32>
    "tpu.trace_start"() <{level = 10 : i32, message = "hqk,hkd->hqd"}> : () -> ()
    %cst_21 = arith.constant dense<0.000000e+00> : vector<4x8x8xf32>
    %51 = tpu.matmul %44, %35, %cst_21 {dimension_numbers = #tpu.dot_dimension_numbers<[2], [1], [1], [2], [0, 0, 0, 1, 1, 2], [0], [0]>} : vector<4x8x4xf32>, vector<4x4x8xf32>, vector<4x8x8xf32> -> vector<4x8x8xf32>
    "tpu.trace_stop"() : () -> ()
    %52 = arith.addf %50, %51 : vector<4x8x8xf32>
    %53 = tpu.reciprocal %48 {approx = true} : vector<4x8x1xf32> -> vector<4x8x1xf32>
    %54 = vector.broadcast %53 : vector<4x8x1xf32> to vector<4x8x8xf32>
    %55 = arith.mulf %52, %54 : vector<4x8x8xf32>
    %56 = tpu.transpose %55, [1, 0, 2] : vector<4x8x8xf32> -> vector<8x4x8xf32>
    %57 = vector.shape_cast %56 : vector<8x4x8xf32> to vector<8x32xf32>
    %c0_22 = arith.constant 0 : index
    %c0_23 = arith.constant 0 : index
    %58 = vector.load %arg7[%c0_22, %c0_23] : memref<32x32xf32, #tpu.memory_space<vmem>>, vector<32x32xf32>
    %cst_24 = arith.constant dense<0.000000e+00> : vector<8x32xf32>
    %59 = tpu.matmul %57, %58, %cst_24 {dimension_numbers = #tpu.dot_dimension_numbers<[1], [0], [0], [1], [0, 0, 1, 1], [], []>} : vector<8x32xf32>, vector<32x32xf32>, vector<8x32xf32> -> vector<8x32xf32>
    %c0_25 = arith.constant 0 : index
    %c0_26 = arith.constant 0 : index
    %60 = vector.load %arg8[%c0_25, %c0_26] : memref<1x32xf32, #tpu.memory_space<vmem>>, vector<1x32xf32>
    %61 = vector.broadcast %60 : vector<1x32xf32> to vector<8x32xf32>
    %62 = arith.addf %59, %61 : vector<8x32xf32>
    %63 = arith.addf %1, %62 : vector<8x32xf32>
    %cst_27 = arith.constant dense<0.000000e+00> : vector<8xf32>
    %64 = vector.multi_reduction <add>, %63, %cst_27 [1] : vector<8x32xf32> to vector<8xf32>
    %65 = vector.shape_cast %64 : vector<8xf32> to vector<8x1xf32>
    %cst_28 = arith.constant 3.200000e+01 : f32
    %66 = vector.broadcast %cst_28 : f32 to vector<8x1xf32>
    %67 = arith.divf %65, %66 : vector<8x1xf32>
    %68 = vector.broadcast %67 : vector<8x1xf32> to vector<8x32xf32>
    %69 = arith.subf %63, %68 : vector<8x32xf32>
    %70 = arith.mulf %69, %69 : vector<8x32xf32>
    %cst_29 = arith.constant dense<0.000000e+00> : vector<8xf32>
    %71 = vector.multi_reduction <add>, %70, %cst_29 [1] : vector<8x32xf32> to vector<8xf32>
    %72 = vector.shape_cast %71 : vector<8xf32> to vector<8x1xf32>
    %cst_30 = arith.constant 3.200000e+01 : f32
    %73 = vector.broadcast %cst_30 : f32 to vector<8x1xf32>
    %74 = arith.divf %72, %73 : vector<8x1xf32>
    %75 = vector.broadcast %67 : vector<8x1xf32> to vector<8x32xf32>
    %76 = arith.subf %63, %75 : vector<8x32xf32>
    %cst_31 = arith.constant 9.99999974E-6 : f32
    %77 = vector.broadcast %cst_31 : f32 to vector<8x1xf32>
    %78 = arith.addf %74, %77 : vector<8x1xf32>
    %79 = math.rsqrt %78 : vector<8x1xf32>
    %80 = vector.broadcast %79 : vector<8x1xf32> to vector<8x32xf32>
    %81 = arith.mulf %76, %80 : vector<8x32xf32>
    %c0_32 = arith.constant 0 : index
    %c0_33 = arith.constant 0 : index
    %82 = vector.load %arg13[%c0_32, %c0_33] : memref<1x32xf32, #tpu.memory_space<vmem>>, vector<1x32xf32>
    %83 = vector.broadcast %82 : vector<1x32xf32> to vector<8x32xf32>
    %84 = arith.mulf %81, %83 : vector<8x32xf32>
    %c0_34 = arith.constant 0 : index
    %c0_35 = arith.constant 0 : index
    %85 = vector.load %arg14[%c0_34, %c0_35] : memref<1x32xf32, #tpu.memory_space<vmem>>, vector<1x32xf32>
    %86 = vector.broadcast %85 : vector<1x32xf32> to vector<8x32xf32>
    %87 = arith.addf %84, %86 : vector<8x32xf32>
    %c0_36 = arith.constant 0 : index
    %c0_37 = arith.constant 0 : index
    %88 = vector.load %arg9[%c0_36, %c0_37] : memref<32x64xf32, #tpu.memory_space<vmem>>, vector<32x64xf32>
    %cst_38 = arith.constant dense<0.000000e+00> : vector<8x64xf32>
    %89 = tpu.matmul %87, %88, %cst_38 {dimension_numbers = #tpu.dot_dimension_numbers<[1], [0], [0], [1], [0, 0, 1, 1], [], []>} : vector<8x32xf32>, vector<32x64xf32>, vector<8x64xf32> -> vector<8x64xf32>
    %c0_39 = arith.constant 0 : index
    %c0_40 = arith.constant 0 : index
    %90 = vector.load %arg10[%c0_39, %c0_40] : memref<1x64xf32, #tpu.memory_space<vmem>>, vector<1x64xf32>
    %91 = vector.broadcast %90 : vector<1x64xf32> to vector<8x64xf32>
    %92 = arith.addf %89, %91 : vector<8x64xf32>
    %cst_41 = arith.constant 0.000000e+00 : f32
    %93 = vector.broadcast %cst_41 : f32 to vector<8x64xf32>
    %94 = arith.maximumf %92, %93 : vector<8x64xf32>
    %c0_42 = arith.constant 0 : index
    %c0_43 = arith.constant 0 : index
    %95 = vector.load %arg11[%c0_42, %c0_43] : memref<64x32xf32, #tpu.memory_space<vmem>>, vector<64x32xf32>
    %cst_44 = arith.constant dense<0.000000e+00> : vector<8x32xf32>
    %96 = tpu.matmul %94, %95, %cst_44 {dimension_numbers = #tpu.dot_dimension_numbers<[1], [0], [0], [1], [0, 0, 1, 1], [], []>} : vector<8x64xf32>, vector<64x32xf32>, vector<8x32xf32> -> vector<8x32xf32>
    %c0_45 = arith.constant 0 : index
    %c0_46 = arith.constant 0 : index
    %97 = vector.load %arg12[%c0_45, %c0_46] : memref<1x32xf32, #tpu.memory_space<vmem>>, vector<1x32xf32>
    %98 = vector.broadcast %97 : vector<1x32xf32> to vector<8x32xf32>
    %99 = arith.addf %96, %98 : vector<8x32xf32>
    %100 = arith.addf %87, %99 : vector<8x32xf32>
    %cst_47 = arith.constant dense<0.000000e+00> : vector<8xf32>
    %101 = vector.multi_reduction <add>, %100, %cst_47 [1] : vector<8x32xf32> to vector<8xf32>
    %102 = vector.shape_cast %101 : vector<8xf32> to vector<8x1xf32>
    %cst_48 = arith.constant 3.200000e+01 : f32
    %103 = vector.broadcast %cst_48 : f32 to vector<8x1xf32>
    %104 = arith.divf %102, %103 : vector<8x1xf32>
    %105 = vector.broadcast %104 : vector<8x1xf32> to vector<8x32xf32>
    %106 = arith.subf %100, %105 : vector<8x32xf32>
    %107 = arith.mulf %106, %106 : vector<8x32xf32>
    %cst_49 = arith.constant dense<0.000000e+00> : vector<8xf32>
    %108 = vector.multi_reduction <add>, %107, %cst_49 [1] : vector<8x32xf32> to vector<8xf32>
    %109 = vector.shape_cast %108 : vector<8xf32> to vector<8x1xf32>
    %cst_50 = arith.constant 3.200000e+01 : f32
    %110 = vector.broadcast %cst_50 : f32 to vector<8x1xf32>
    %111 = arith.divf %109, %110 : vector<8x1xf32>
    %112 = vector.broadcast %104 : vector<8x1xf32> to vector<8x32xf32>
    %113 = arith.subf %100, %112 : vector<8x32xf32>
    %cst_51 = arith.constant 9.99999974E-6 : f32
    %114 = vector.broadcast %cst_51 : f32 to vector<8x1xf32>
    %115 = arith.addf %111, %114 : vector<8x1xf32>
    %116 = math.rsqrt %115 : vector<8x1xf32>
    %117 = vector.broadcast %116 : vector<8x1xf32> to vector<8x32xf32>
    %118 = arith.mulf %113, %117 : vector<8x32xf32>
    %c0_52 = arith.constant 0 : index
    %c0_53 = arith.constant 0 : index
    %119 = vector.load %arg15[%c0_52, %c0_53] : memref<1x32xf32, #tpu.memory_space<vmem>>, vector<1x32xf32>
    %120 = vector.broadcast %119 : vector<1x32xf32> to vector<8x32xf32>
    %121 = arith.mulf %118, %120 : vector<8x32xf32>
    %c0_54 = arith.constant 0 : index
    %c0_55 = arith.constant 0 : index
    %122 = vector.load %arg16[%c0_54, %c0_55] : memref<1x32xf32, #tpu.memory_space<vmem>>, vector<1x32xf32>
    %123 = vector.broadcast %122 : vector<1x32xf32> to vector<8x32xf32>
    %124 = arith.addf %121, %123 : vector<8x32xf32>
    %c0_56 = arith.constant 0 : index
    %c0_57 = arith.constant 0 : index
    %c0_58 = arith.constant 0 : index
    %125 = vector.load %arg17[%c0_56, %c0_57, %c0_58] : memref<1x8x32xf32, #tpu.memory_space<vmem>>, vector<1x8x32xf32>
    %126 = vector.shape_cast %125 : vector<1x8x32xf32> to vector<8x32xf32>
    %127 = vector.shape_cast %124 : vector<8x32xf32> to vector<1x8x32xf32>
    tpu.vector_store %arg17[%c0_56, %c0_57, %c0_58], %127 {strides = array<i32>} : memref<1x8x32xf32, #tpu.memory_space<vmem>>, vector<1x8x32xf32>,
    return
  }
  func.func @transform_0(%arg0: i32) -> (i32, i32, i32) {
    %c0_i32 = arith.constant 0 : i32
    %c0_i32_0 = arith.constant 0 : i32
    %c0_i32_1 = arith.constant 0 : i32
    return %arg0, %c0_i32, %c0_i32_0 : i32, i32, i32
  }
  func.func @transform_1(%arg0: i32) -> (i32, i32, i32) {
    %c0_i32 = arith.constant 0 : i32
    %c0_i32_0 = arith.constant 0 : i32
    %c0_i32_1 = arith.constant 0 : i32
    return %arg0, %c0_i32, %c0_i32_0 : i32, i32, i32
  }
  func.func @transform_2(%arg0: i32) -> (i32, i32) {
    %c0_i32 = arith.constant 0 : i32
    %c0_i32_0 = arith.constant 0 : i32
    %c0_i32_1 = arith.constant 0 : i32
    return %c0_i32, %c0_i32_0 : i32, i32
  }
  func.func @transform_3(%arg0: i32) -> (i32, i32) {
    %c0_i32 = arith.constant 0 : i32
    %c0_i32_0 = arith.constant 0 : i32
    %c0_i32_1 = arith.constant 0 : i32
    return %c0_i32, %c0_i32_0 : i32, i32
  }
  func.func @transform_4(%arg0: i32) -> (i32, i32) {
    %c0_i32 = arith.constant 0 : i32
    %c0_i32_0 = arith.constant 0 : i32
    %c0_i32_1 = arith.constant 0 : i32
    return %c0_i32, %c0_i32_0 : i32, i32
  }
  func.func @transform_5(%arg0: i32) -> (i32, i32) {
    %c0_i32 = arith.constant 0 : i32
    %c0_i32_0 = arith.constant 0 : i32
    %c0_i32_1 = arith.constant 0 : i32
    return %c0_i32, %c0_i32_0 : i32, i32
  }
  func.func @transform_6(%arg0: i32) -> (i32, i32) {
    %c0_i32 = arith.constant 0 : i32
    %c0_i32_0 = arith.constant 0 : i32
    %c0_i32_1 = arith.constant 0 : i32
    return %c0_i32, %c0_i32_0 : i32, i32
  }
  func.func @transform_7(%arg0: i32) -> (i32, i32) {
    %c0_i32 = arith.constant 0 : i32
    %c0_i32_0 = arith.constant 0 : i32
    %c0_i32_1 = arith.constant 0 : i32
    return %c0_i32, %c0_i32_0 : i32, i32
  }
  func.func @transform_8(%arg0: i32) -> (i32, i32) {
    %c0_i32 = arith.constant 0 : i32
    %c0_i32_0 = arith.constant 0 : i32
    %c0_i32_1 = arith.constant 0 : i32
    return %c0_i32, %c0_i32_0 : i32, i32
  }
  func.func @transform_9(%arg0: i32) -> (i32, i32) {
    %c0_i32 = arith.constant 0 : i32
    %c0_i32_0 = arith.constant 0 : i32
    %c0_i32_1 = arith.constant 0 : i32
    return %c0_i32, %c0_i32_0 : i32, i32
  }
  func.func @transform_10(%arg0: i32) -> (i32, i32) {
    %c0_i32 = arith.constant 0 : i32
    %c0_i32_0 = arith.constant 0 : i32
    %c0_i32_1 = arith.constant 0 : i32
    return %c0_i32, %c0_i32_0 : i32, i32
  }
  func.func @transform_11(%arg0: i32) -> (i32, i32) {
    %c0_i32 = arith.constant 0 : i32
    %c0_i32_0 = arith.constant 0 : i32
    %c0_i32_1 = arith.constant 0 : i32
    return %c0_i32, %c0_i32_0 : i32, i32
  }
  func.func @transform_12(%arg0: i32) -> (i32, i32) {
    %c0_i32 = arith.constant 0 : i32
    %c0_i32_0 = arith.constant 0 : i32
    %c0_i32_1 = arith.constant 0 : i32
    return %c0_i32, %c0_i32_0 : i32, i32
  }
  func.func @transform_13(%arg0: i32) -> (i32, i32) {
    %c0_i32 = arith.constant 0 : i32
    %c0_i32_0 = arith.constant 0 : i32
    %c0_i32_1 = arith.constant 0 : i32
    return %c0_i32, %c0_i32_0 : i32, i32
  }
  func.func @transform_14(%arg0: i32) -> (i32, i32) {
    %c0_i32 = arith.constant 0 : i32
    %c0_i32_0 = arith.constant 0 : i32
    %c0_i32_1 = arith.constant 0 : i32
    return %c0_i32, %c0_i32_0 : i32, i32
  }
  func.func @transform_15(%arg0: i32) -> (i32, i32) {
    %c0_i32 = arith.constant 0 : i32
    %c0_i32_0 = arith.constant 0 : i32
    %c0_i32_1 = arith.constant 0 : i32
    return %c0_i32, %c0_i32_0 : i32, i32
  }
  func.func @transform_16(%arg0: i32) -> (i32, i32, i32) {
    %c0_i32 = arith.constant 0 : i32
    %c0_i32_0 = arith.constant 0 : i32
    %c0_i32_1 = arith.constant 0 : i32
    return %arg0, %c0_i32, %c0_i32_0 : i32, i32, i32
  }
}

</mosaic_0001>

<bundles_post_ra>
// kernel: tpu_custom_call.1
= control target key start
LH: loop header
LB: loop body
LE: loop exit
PB: predicated region body
PF: predicated region fallthrough
CT: control target
= control target key end

     0   :  { %s4419_s0 = inlined_call_operand.hbm [shape: f32[2,8,32], index: 0, kind: input, shape index: {}]   ;;  %s4420_s1 = inlined_call_operand.hbm [shape: f32[2,8,32], index: 1, kind: input, shape index: {}]   ;;  %s4421_s2 = inlined_call_operand.vmem [shape: f32[32,64], index: 2, kind: input, shape index: {}]   ;;  %s4422_s3 = inlined_call_operand.vmem [shape: f32[1,64], index: 3, kind: input, shape index: {}]   ;;  %s4423_s4 = inlined_call_operand.vmem [shape: f32[32,32], index: 4, kind: input, shape index: {}]   ;;  %s4424_s5 = inlined_call_operand.vmem [shape: f32[1,32], index: 5, kind: input, shape index: {}]   ;;  %s4425_s6 = inlined_call_operand.vmem [shape: f32[32,32], index: 6, kind: input, shape index: {}]   ;;  %s4426_s7 = inlined_call_operand.vmem [shape: f32[1,32], index: 7, kind: input, shape index: {}]   ;;  %s4427_s8 = inlined_call_operand.hbm [shape: f32[32,64], index: 8, kind: input, shape index: {}]   ;;  %s4428_s9 = inlined_call_operand.vmem [shape: f32[1,64], index: 9, kind: input, shape index: {}]   ;;  %s4429_s10 = inlined_call_operand.vmem [shape: f32[64,32], index: 10, kind: input, shape index: {}]   ;;  %s4430_s11 = inlined_call_operand.vmem [shape: f32[1,32], index: 11, kind: input, shape index: {}]   ;;  %s4431_s12 = inlined_call_operand.vmem [shape: f32[1,32], index: 12, kind: input, shape index: {}]   ;;  %s4432_s13 = inlined_call_operand.vmem [shape: f32[1,32], index: 13, kind: input, shape index: {}]   ;;  %s4433_s14 = inlined_call_operand.vmem [shape: f32[1,32], index: 14, kind: input, shape index: {}]   ;;  %s4434_s15 = inlined_call_operand.vmem [shape: f32[1,32], index: 15, kind: input, shape index: {}]   ;;  %s4435_s16 = inlined_call_operand.hbm [shape: f32[2,8,32], index: 16, kind: output, shape index: {}]  }
   0x1   :  { %4449 = sst [smem:[#allocation19_spill]] %s4419_s0 }
   0x2   :  { %4450 = sst [smem:[#allocation20_spill]] %s4427_s8 }
   0x3   :  { %4451 = sst [smem:[#allocation21_spill]] %s4428_s9 }
   0x4   :  { %4452 = sst [smem:[#allocation22_spill]] %s4430_s11 }
   0x5   :  { %4453 = sst [smem:[#allocation23_spill]] %s4432_s13 }
   0x6   :  { %4454 = sst [smem:[#allocation24_spill]] %s4433_s14 }
   0x7   :  { %4455 = sst [smem:[#allocation25_spill]] %s4434_s15 }
   0x8   :  { %4456 = sst [smem:[#allocation26_spill]] %s4435_s16 }
   0x9   :  { %21 = vsyncpa [#allocation3], 0 }
   0xa   :  { %23 = vsyncpa [#allocation3 + $0x1], 0 }
   0xb   :  { %24 = vsyncpa [#allocation6], 0 }
   0xc   :  { %26 = vsyncpa [#allocation6 + $0x1], 0 }
   0xd   :  { %27 = vsyncpa [#allocation4], 0 }
   0xe   :  { %29 = vsyncpa [#allocation4 + $0x1], 0  ;;  %s3798_s21 = smov 0   ;;  %s3800_s22 = smov 0  }
   0xf   :  { %s3802_s23 = smov 0   ;;  %s3804_s24 = smov 0  }
  0x10 LB: > { %4457 = sst [smem:[#allocation13_spill]] %s3681_s21  ;;  %s3819_s25 = sadd.s32 4294967295, %s3693_s24   ;;  %s3693_s24 = sphi %s3804_s24, %s4488_s24   ;;  %s3689_s23 = sphi %s3802_s23, %s4490_s23   ;;  %s3685_s22 = sphi %s3800_s22, %s4492_s22   ;;  %s3681_s21 = sphi %s3798_s21, %s4491_s21  }
  0x11   : > { %4458 = sst [smem:[#allocation14_spill]] %s3689_s23  ;;  %s3108_s26 = sadd.s32 4294967294, %s3693_s24  }
  0x12   : > { %p55_p0 = scmp.ne.s32.totalorder %s3685_s22, %s3681_s21  ;;  %p4442_p1 = scmp.eq.s32.totalorder %s3819_s25, 0 }
  0x13   : > { %p405_p3 = scmp.eq.s32.totalorder %s3108_s26, 1  ;;  %p3109_p5 = scmp.ge.s32.totalorder %s3693_s24, 1 }
  0x14   : > { %p3828_p4 = por %p4442_p1, %p55_p0  ;;  %p412_p7 = scmp.lt.s32.totalorder %s3693_s24, 3 }
  0x15   : > { %p3833_p6 = por %p405_p3, %p55_p0  ;;  %s3695_s30 = smov [#allocation7]  }
  0x16   : > { %s4459_s27 = scalar_select %p3828_p4, 1, 0 }
  0x17   : > { %s4460_s28 = scalar_select %p3833_p6, 1, 0 }
  0x18   : > { %p3838_p8 = pnand %p3109_p5, %p412_p7  ;;  %s442_s0 = sshll.u32 %s3695_s30, 4  ;;  %s3842_s0 = int_to_ptr.vmem [resolvable:$true] %s442_s0 }
  0x19   : > { %4461 = sst [smem:[#allocation15_spill]] %s4460_s28  ;;  %s3854_s18 = sadd.s32 1, %s3693_s24  }
  0x1a   : > { %s4462_s29 = scalar_select %p3838_p8, 1, 0 }
  0x1b   : > { %p3429_p9 = pneg %p3838_p8  ;;  %4464 = sst [smem:[#allocation16_spill]] %s3854_s18 }
  0x1c   : > { %s42_s19 = sadd.s32 1, %s3689_s23  ;;  %s39_s20 = ssub.s32 %s3693_s24, %s3854_s18 }
  0x1d   : > { %p3849_p11 = pnand %p3429_p9, %p4442_p1  ;;  %s4465_s8 = sld [smem:[#allocation20_spill]] }
  0x1f   : > { %p3533_p13 = pneg %p3849_p11 }
  0x23   : > { %s3531_s30 = scalar_lea.hbm %s4465_s8, 512 }
  0x24   : > { %p3532_p12 = scmp.ne.s32.totalorder %s4465_s8, %s3531_s30  ;;  %p3538_p5 = scmp.lt.u32.totalorder %s3531_s30, %s4465_s8 }
  0x26   : > { %p3534_p0 = pnand %p3533_p13, %p3532_p12 }
  0x28   : > { %p3535_p3 = pneg %p3534_p0 }
  0x2a   : > { %p3540_p7 = pnand %p3538_p5, %p3535_p3 }
  0x2c   : > { %3543 = shalt.err (!%p3540_p7)
}
  0x2d   : > { %s3544_s18 = scalar_lea.vmem %s3842_s0, 512  ;;  %p3552_p2 = scmp.lt.s32.totalorder %s3842_s0, %s3842_s0 }
  0x2e   : > { %p3545_p9 = scmp.ne.s32.totalorder %s3842_s0, %s3544_s18  ;;  %p3553_p6 = scmp.lt.s32.totalorder %s3544_s18, %s3544_s18 }
  0x30   : > { %p3547_p10 = pnand %p3545_p9, %p3533_p13  ;;  %p3554_p4 = por %p3553_p6, %p3552_p2 }
  0x32   : > { %p3548_p1 = pneg %p3547_p10 }
  0x34   : > { %p3555_p8 = pnand %p3554_p4, %p3548_p1 }
  0x36   : > { %3558 = shalt.err (!%p3555_p8)
}
  0x37   : > { %s3696_s16 = smov 128   ;;  %s3697_s14 = smov 8  }
  0x38   : > { %3432 = dma.hbm_to_vmem [thread:$0]  (!%p3849_p11), %s4465_s8, 512, %s3842_s0, [#allocation6], %s3696_s16, %s3696_s16, %s3697_s14  }
  0x39   : > { %p40_p2 = scmp.eq.s32.totalorder %s39_s20, 0  ;;  %p49_p1 = scmp.ne.s32.totalorder %s3689_s23, %s3685_s22 }
  0x3a   : > { %p50_p4 = scmp.eq.s32.totalorder %s3693_s24, 0  ;;  %p3445_p6 = scmp.lt.s32.totalorder %s3693_s24, 2 }
  0x3b   : > { %s3885_s28 = scalar_select %p40_p2, %s3689_s23, %s42_s19  }
  0x3c   : > { %p51_p8 = por %p50_p4, %p49_p1  ;;  %p4467_p10 = scmp.eq.s32.totalorder %s3819_s25, 1 }
  0x3d   : > { %4466 = sst [smem:[#allocation17_spill]] %s3885_s28  ;;  %s477_s26 = sand.u32 1, %s3689_s23  }
  0x3e   : > { %p3889_p12 = por %p4467_p10, %p49_p1  ;;  %s3113_s30 = sshll.u32 %s3693_s24, 7 }
  0x3f   : > { %s3895_s11 = sshll.u32 %s477_s26, 3  ;;  %s4470_s15 = sld [smem:[#allocation19_spill]] }
  0x40   : > { %s4468_s18 = scalar_select %p3889_p12, 1, 0 }
  0x41   : > { %s481_s19 = scalar_lea.vmem [#allocation2], %s3895_s11  ;;  %p3903_p11 = pnand %p3445_p6, %p51_p8 }
  0x42   : > { %4469 = sst [smem:[#allocation18_spill]] %s4468_s18  ;;  %s488_s20 = sshll.u32 %s481_s19, 4  ;;  %s3907_s20 = int_to_ptr.vmem [resolvable:$true] %s488_s20 }
  0x43   : > { %s3912_s9 = scalar_lea.hbm %s4420_s1, %s3113_s30  ;;  %s478_s17 = scalar_lea.sflag [#allocation3], %s477_s26 }
  0x44   : > { %p3561_p0 = pneg %p3903_p11 }
  0x45   : > { %s3900_s0 = scalar_lea.hbm %s4470_s15, %s3113_s30  ;;  %s3564_s23 = scalar_lea.hbm %s4470_s15, 256 }
  0x46   : > { %s3559_s8 = scalar_lea.hbm %s3900_s0, 128  ;;  %p3565_p7 = scmp.lt.u32.totalorder %s3900_s0, %s4470_s15 }
  0x47   : > { %p3560_p13 = scmp.ne.s32.totalorder %s3900_s0, %s3559_s8  ;;  %p3566_p9 = scmp.lt.u32.totalorder %s3564_s23, %s3559_s8 }
  0x48   : > { %p3568_p1 = scmp.lt.u32.totalorder %s3559_s8, %s3900_s0 }
  0x49   : > { %p3562_p3 = pnand %p3561_p0, %p3560_p13  ;;  %p3567_p2 = por %p3566_p9, %p3565_p7 }
  0x4b   : > { %p3563_p5 = pneg %p3562_p3  ;;  %p3569_p4 = por %p3568_p1, %p3567_p2 }
  0x4d   : > { %p3570_p6 = pnand %p3569_p4, %p3563_p5 }
  0x4f   : > { %3573 = shalt.err (!%p3570_p6)
}
  0x50   : > { %s3574_s26 = scalar_lea.vmem %s3907_s20, 128  ;;  %s3698_s28 = smov [#allocation2]  }
  0x51   : > { %p3575_p8 = scmp.ne.s32.totalorder %s3907_s20, %s3574_s26  ;;  %s3579_s30 = sshll.u32 %s3698_s28, 4  ;;  %s3580_s30 = int_to_ptr.vmem [resolvable:$false] %s3579_s30 }
  0x52   : > { %s3581_s13 = scalar_lea.vmem %s3580_s30, 256  ;;  %p3582_p3 = scmp.lt.s32.totalorder %s3907_s20, %s3580_s30 }
  0x53   : > { %p3577_p10 = pnand %p3575_p8, %p3561_p0  ;;  %p3583_p7 = scmp.lt.s32.totalorder %s3581_s13, %s3574_s26 }
  0x55   : > { %p3578_p13 = pneg %p3577_p10  ;;  %p3584_p9 = por %p3583_p7, %p3582_p3 }
  0x57   : > { %p3585_p2 = pnand %p3584_p9, %p3578_p13 }
  0x59   : > { %3588 = shalt.err (!%p3585_p2)
}
  0x5a   : > { %3436 = dma.hbm_to_vmem [thread:$0]  (!%p3903_p11), %s3900_s0, 128, %s3907_s20, %s478_s17  }
  0x5b   : > { %s495_s8 = sand.u32 1, %s3693_s24   ;;  %s499_s23 = scalar_lea.vmem [#allocation5], %s3895_s11 }
  0x5c   : > { %s506_s18 = sshll.u32 %s499_s23, 4  ;;  %s496_s14 = scalar_lea.sflag [#allocation6], %s495_s8  ;;  %s507_s18 = int_to_ptr.vmem [resolvable:$true] %s506_s18 }
  0x5d   : > { %s3589_s21 = scalar_lea.hbm %s3912_s9, 128  ;;  %s3594_s28 = scalar_lea.hbm %s4420_s1, 256 }
  0x5e   : > { %p3590_p5 = scmp.ne.s32.totalorder %s3912_s9, %s3589_s21  ;;  %p3595_p6 = scmp.lt.u32.totalorder %s3912_s9, %s4420_s1 }
  0x5f   : > { %p3596_p8 = scmp.lt.u32.totalorder %s3594_s28, %s3589_s21  ;;  %p3598_p13 = scmp.lt.u32.totalorder %s3589_s21, %s3912_s9 }
  0x60   : > { %p3592_p1 = pnand %p3590_p5, %p3561_p0 }
  0x61   : > { %p3597_p10 = por %p3596_p8, %p3595_p6 }
  0x62   : > { %p3593_p4 = pneg %p3592_p1 }
  0x63   : > { %p3599_p3 = por %p3598_p13, %p3597_p10 }
  0x65   : > { %p3600_p7 = pnand %p3599_p3, %p3593_p4 }
  0x67   : > { %3603 = shalt.err (!%p3600_p7)
}
  0x68   : > { %s3604_s11 = scalar_lea.vmem %s507_s18, 128  ;;  %s3699_s0 = smov [#allocation5]  }
  0x69   : > { %p3605_p9 = scmp.ne.s32.totalorder %s507_s18, %s3604_s11  ;;  %s3609_s20 = sshll.u32 %s3699_s0, 4  ;;  %s3610_s20 = int_to_ptr.vmem [resolvable:$false] %s3609_s20 }
  0x6a   : > { %s3611_s17 = scalar_lea.vmem %s3610_s20, 256  ;;  %p3612_p1 = scmp.lt.s32.totalorder %s507_s18, %s3610_s20 }
  0x6b   : > { %p3607_p2 = pnand %p3605_p9, %p3561_p0  ;;  %p3613_p12 = scmp.lt.s32.totalorder %s3611_s17, %s3604_s11 }
  0x6d   : > { %p3608_p5 = pneg %p3607_p2  ;;  %p3614_p6 = por %p3613_p12, %p3612_p1 }
  0x6f   : > { %p3615_p8 = pnand %p3614_p6, %p3608_p5 }
  0x71   : > { %3618 = shalt.err (!%p3615_p8)
}
  0x72   : > { %3439 = dma.hbm_to_vmem [thread:$0]  (!%p3903_p11), %s3912_s9, 128, %s507_s18, %s496_s14  }
  0x73   : > { %p4472_p4 = scmp.ne.s32.totalorder %s4462_s29, 0 }
  0x74   : > { %s3963_s8 = sand.u32 (!%p4472_p4), 1, %s3685_s22   ;;  %p4473_p12 = scmp.ne.s32.totalorder (!%p4472_p4), %s4459_s27, 0 }
  0x75   : > { %515 = sbr.rel (%p4472_p4) target bundleno = 3076 (0xc04), region = 84  ;;  %s3966_s23 = sshll.u32 (!%p4472_p4), %s3963_s8, 3 }
  0x76   : > { %s518_s21 = scalar_lea.sflag (!%p4472_p4), [#allocation3], %s3963_s8  ;;  %s521_s19 = scalar_lea.vmem (!%p4472_p4), [#allocation2], %s3966_s23 }
  0x7c   : > { %3664 = dma.done.wait (%p4473_p12), %s518_s21, 128  }
  0x7d   : > { %3666 = vsyncadd (%p4473_p12), %s518_s21, 4294967168  ;;  %s526_s29 = sand.u32 1, %s3819_s25   ;;  %s530_s9 = scalar_lea.vmem [#allocation5], %s3966_s23 }
  0x7e   : > { %s527_s16 = scalar_lea.sflag [#allocation6], %s526_s29 }
  0x7f   : > { %3668 = dma.done.wait (%p4473_p12), %s527_s16, 128  }
  0x80   : > { %3670 = vsyncadd (%p4473_p12), %s527_s16, 4294967168  ;;  %p4474_p11 = scmp.eq.s32.totalorder %s3819_s25, 0 }
  0x82   : > { %3672 = dma.done.wait (%p4474_p11), [#allocation6], 512   ;;  %p4475_p0 = pmov %p4474_p11 }
  0x83   : > { %v3700_v0 = vmov 0.0|0.0   ;;  %vm3701_vm0 = vmmov 0   ;;  %v3702_v1 = vmov 0.0   ;;  %v591_v2 = vld [vmem:[%s4421_s2] sm:$0xff]  ;;  %v592_v3 = vld [vmem:[%s4421_s2 + $0x8] sm:$0xff]  ;;  %v593_v4 = vld [vmem:[%s4421_s2 + $0x10] sm:$0xff]  ;;  %v775_v19 = vlaneseq }
  0x84   : > { %3674 = vsyncadd (%p4475_p0), [#allocation6], 4294966784  ;;  %3383 = vmatprep.subr.bf16.mxu1 %v3700_v0  ;;  %3248 = vmatprep.mubr.msk.f32.mxu1 %vm3701_vm0, %v3702_v1  ;;  %v3384_v5 = vpack.c.bf16 %v592_v3, %v591_v2  ;;  %v594_v6 = vld [vmem:[%s4421_s2 + $0x18] sm:$0xff]  ;;  %v4002_v8 = vld [vmem:[%s521_s19] sm:$0xff]  ;;  %vm602_vm1 = vcmask 261120   ;;  %s3703_s17 = smov 104  }
  0x85   : > { %3262 = vmatprep.subr.mxu0 %v3702_v1  ;;  %3264 = vmatprep.mubr.msk.f32.mxu0 %vm3701_vm0, %v3702_v1  ;;  %v3387_v7 = vpack.c.bf16 %v594_v6, %v593_v4  ;;  %v589_v9 = vld [vmem:[%s530_s9] sm:$0xff]  ;;  %v3121_v11 = vld [vmem:[%s4422_s3] ss:$0 sm:$0xff]  ;;  %s3704_s21 = smov 120   ;;  %s3705_s19 = smov 96   ;;  %v677_v16 = vld [vmem:[%s4423_s4 + $0x8] sm:$0xff] }
  0x86   : > { %3385 = vmatpush3.bf16.msra.mxu1 %v3384_v5  ;;  %v590_v10 = vadd.f32 %v589_v9, %v4002_v8  ;;  %s3706_s29 = smov 112   ;;  %v676_v15 = vld [vmem:[%s4423_s4] sm:$0xff]  ;;  %v3707_v17 = vmov 1983009808   ;;  %v3708_v21 = vmov 1934713408  }
  0x87   : > { %3386 = vmatprep.subr.bf16.mxu1 %v3700_v0  ;;  %v773_v18 = vunpack.c.l.s4 %v3707_v17  ;;  %v3390_v20 = vpack.c.bf16 %v677_v16, %v676_v15  ;;  %v805_v22 = vunpack.c.l.s4 %v3708_v21  ;;  %v678_v23 = vld [vmem:[%s4423_s4 + $0x10] sm:$0xff]  ;;  %v679_v24 = vld [vmem:[%s4423_s4 + $0x18] sm:$0xff]  ;;  %v776_v26 = vshrl.u32 %v775_v19, 7  ;;  %s3709_s27 = smov 16   ;;  %s3710_s18 = smov 8  }
  0x88   : > { %v3393_v27 = vpack.c.bf16 %v679_v24, %v678_v23  ;;  %vm1200_vm2 = vcmask 64512   ;;  %vm1505_vm3 = vcmask 31744   ;;  %vm1545_vm4 = vcmask 1043456   ;;  %s3711_s14 = smov 24   ;;  %s4476_s30 = sld [smem:[#allocation23_spill]] }
  0x89   : > { %v774_v25 = vunpack.c.0.s8 %v773_v18  ;;  %v806_v32 = vunpack.c.0.s8 %v805_v22  ;;  %vm2668_vm5 = vcmask 130048   ;;  %vm2670_vm6 = vcmask 195584   ;;  %s4478_s9 = sld [smem:[#allocation22_spill]]  ;;  %s4480_s26 = sld [smem:[#allocation24_spill]] }
  0x8a   : > { %3388 = vmatpush3.bf16.msra.mxu1 %v3387_v7  ;;  %vm2887_vm7 = vcmask 523264   ;;  %s4481_s13 = sld [smem:[#allocation25_spill]]  ;;  %s3176_s11 = sshll.u32 %s3819_s25, 7 }
  0x8b   : > { %3389 = vmatprep.subr.bf16.mxu1 %v3700_v0  ;;  %v4032_v33 = vsub.s32 %v774_v25, %v776_v26  ;;  %v4038_v37 = vsub.s32 %v806_v32, %v776_v26  ;;  %s587_s0 = scalar_lea.vmem [#allocation8], %s3966_s23  ;;  %s2993_s16 = scalar_lea.sflag [#allocation4], %s3963_s8 }
  0x8c   : > { %s3006_s20 = sshll.u32 %s587_s0, 4  ;;  %s3712_s25 = smov [#allocation8]   ;;  %s4376_s20 = int_to_ptr.vmem [resolvable:$true] %s3006_s20 }
  0x8d   : > { %3249 = vmatmul.mubr.msk.f32.vlgmr.msra.gmra.mrb[0].mxu1 %vm602_vm1, %v590_v10  ;;  %s3623_s23 = sshll.u32 %s3712_s25, 4  ;;  %s3624_s23 = int_to_ptr.vmem [resolvable:$false] %s3623_s23 }
  0x8e   : > { %3259 = vmatprep.mubr.msk.f32.mxu1 %vm3701_vm0, %v3702_v1  ;;  %3391 = vmatpush3.bf16.msra.mxu1 %v3390_v20  ;;  %p3626_p9 = scmp.lt.s32.totalorder %s4376_s20, %s3624_s23 }
  0x8f   : > { %3392 = vmatprep.subr.bf16.mxu1 %v3700_v0 }
  0x92   : > { %3394 = vmatpush3.bf16.msra.mxu1 %v3393_v27 }
  0x93   : > { %3267 = vmatprep.subr.mxu1 %v3702_v1 }
  0x95   : > { %3260 = vmatmul.mubr.msk.f32.vlgmr.msra.gmra.mrb[2].mxu1 %vm602_vm1, %v4002_v8 }
  0x96   : > { %3269 = vmatprep.mubr.msk.f32.mxu1 %vm3701_vm0, %v3702_v1 }
 0x160   : > { %v672_v12 = vpop.f32.mrb[0].mxu1 }
 0x161   : > { %v673_v13 = vadd.f32 %v3121_v11, %v672_v12  ;;  %v3250_v14 = vpop.f32.mrb[1].mxu1 }
 0x163   : > { %767 = vrot.lane.b32.xlu1 %v673_v13, %s3703_s17  ;;  %761 = vrot.lane.b32.xlu0 %v673_v13, %s3704_s21 }
 0x167   : > { %906 = vrot.lane.b32.xlu1 %v673_v13, %s3705_s19  ;;  %764 = vrot.lane.b32.xlu0 %v673_v13, %s3706_s29 }
 0x1d5   : > { %v768_v28 = vpop.permute.xlu1 %767  ;;  %v762_v29 = vpop.permute.xlu0 %761 }
 0x1d6   : > { %v786_v30 = vcombine.low %v762_v29, %v768_v28  ;;  %v787_v31 = vcombine.high %v762_v29, %v768_v28  ;;  %908 = vrot.lane.b32.xlu0 %v762_v29, %s3705_s19 }
 0x1d8   : > { %v794_v38 = vrot.slane %v786_v30, %v4032_v33  ;;  %v801_v39 = vrot.slane %v787_v31, %v4032_v33 }
 0x1d9   : > { %v765_v34 = vpop.permute.xlu0 %764  ;;  %v907_v9 = vpop.permute.xlu1 %906 }
 0x1da   : > { %v770_v35 = vcombine.low %v673_v13, %v765_v34  ;;  %v771_v36 = vcombine.high %v673_v13, %v765_v34  ;;  %912 = vrot.lane.b32.xlu0 %v768_v28, %s3705_s19  ;;  %910 = vrot.lane.b32.xlu1 %v765_v34, %s3705_s19  ;;  %s4477_s19 = sld [smem:[#allocation21_spill]] }
 0x1dc   : > { %v778_v40 = vrot.slane %v770_v35, %v4032_v33  ;;  %v785_v41 = vrot.slane %v771_v36, %v4032_v33 }
 0x1de   : > { %v802_v42 = vcombine.low %v778_v40, %v794_v38  ;;  %v803_v43 = vcombine.high %v778_v40, %v794_v38  ;;  %v818_v44 = vcombine.low %v785_v41, %v801_v39  ;;  %v819_v45 = vcombine.high %v785_v41, %v801_v39 }
 0x1e0   : > { %v810_v46 = vrot.slane %v802_v42, %v4038_v37  ;;  %v817_v47 = vrot.slane %v803_v43, %v4038_v37  ;;  %v826_v48 = vrot.slane %v818_v44, %v4038_v37  ;;  %v833_v49 = vrot.slane %v819_v45, %v4038_v37 }
 0x1e2   : > { %v838_v50 = vcombine.low %v810_v46, %v817_v47  ;;  %v3125_v51 = vcombine.high %v810_v46, %v817_v47  ;;  %v854_v52 = vcombine.low %v826_v48, %v833_v49  ;;  %v3126_v53 = vcombine.high %v826_v48, %v833_v49 }
 0x1e4   : > { %v845_v54 = vrot.slane %v838_v50, %v4032_v33  ;;  %v853_v55 = vrot.slane %v3125_v51, %v4032_v33  ;;  %v861_v56 = vrot.slane %v854_v52, %v4032_v33  ;;  %v869_v57 = vrot.slane %v3126_v53, %v4032_v33  ;;  %v756_v51 = vpop.f32.mrb[2].mxu1 }
 0x1e5   : > { %v3261_v52 = vpop.f32.mrb[3].mxu1 }
 0x1e6   : > { %v870_v58 = vcombine.low %v845_v54, %v853_v55  ;;  %v871_v59 = vcombine.high %v845_v54, %v853_v55  ;;  %v886_v60 = vcombine.low %v861_v56, %v869_v57  ;;  %v887_v61 = vcombine.high %v861_v56, %v869_v57 }
 0x1e8   : > { %v878_v62 = vrot.slane %v870_v58, %v4038_v37  ;;  %v894_v63 = vrot.slane %v886_v60, %v4038_v37  ;;  %v885_v2 = vrot.slane %v871_v59, %v4038_v37  ;;  %v901_v3 = vrot.slane %v887_v61, %v4038_v37 }
 0x1ea   : > { %v4058_v4 = vcombine.low %v878_v62, %v894_v63  ;;  %v4060_v5 = vcombine.high %v878_v62, %v894_v63  ;;  %v4062_v6 = vcombine.low %v885_v2, %v901_v3  ;;  %v4064_v7 = vcombine.high %v885_v2, %v901_v3  ;;  %v3123_v2 = vld [vmem:[%s4424_s5] ss:$0 sm:$0xff] }
 0x1eb   : > { %v757_v3 = vadd.f32 %v3123_v2, %v756_v51 }
 0x248   : > { %v909_v10 = vpop.permute.xlu0 %908 }
 0x24c   : > { %v911_v11 = vpop.permute.xlu1 %910  ;;  %v913_v12 = vpop.permute.xlu0 %912 }
 0x24d   : > { %v918_v13 = vcombine.low %v907_v9, %v911_v11  ;;  %v919_v14 = vcombine.high %v907_v9, %v911_v11  ;;  %v934_v15 = vcombine.low %v909_v10, %v913_v12  ;;  %v935_v16 = vcombine.high %v909_v10, %v913_v12 }
 0x24f   : > { %v926_v17 = vrot.slane %v918_v13, %v4032_v33  ;;  %v933_v18 = vrot.slane %v919_v14, %v4032_v33  ;;  %v942_v19 = vrot.slane %v934_v15, %v4032_v33  ;;  %v949_v20 = vrot.slane %v935_v16, %v4032_v33 }
 0x251   : > { %v950_v21 = vcombine.low %v926_v17, %v942_v19  ;;  %v951_v22 = vcombine.high %v926_v17, %v942_v19  ;;  %v966_v23 = vcombine.low %v933_v18, %v949_v20  ;;  %v967_v24 = vcombine.high %v933_v18, %v949_v20 }
 0x253   : > { %v958_v25 = vrot.slane %v950_v21, %v4038_v37  ;;  %v965_v26 = vrot.slane %v951_v22, %v4038_v37  ;;  %v974_v27 = vrot.slane %v966_v23, %v4038_v37  ;;  %v981_v28 = vrot.slane %v967_v24, %v4038_v37 }
 0x255   : > { %v986_v29 = vcombine.low %v958_v25, %v965_v26  ;;  %v3127_v30 = vcombine.high %v958_v25, %v965_v26  ;;  %v1002_v31 = vcombine.low %v974_v27, %v981_v28  ;;  %v3128_v32 = vcombine.high %v974_v27, %v981_v28 }
 0x257   : > { %v993_v34 = vrot.slane %v986_v29, %v4032_v33  ;;  %v1001_v35 = vrot.slane %v3127_v30, %v4032_v33  ;;  %v1009_v36 = vrot.slane %v1002_v31, %v4032_v33  ;;  %v1017_v38 = vrot.slane %v3128_v32, %v4032_v33 }
 0x259   : > { %v1018_v39 = vcombine.low %v993_v34, %v1001_v35  ;;  %v1019_v40 = vcombine.high %v993_v34, %v1001_v35  ;;  %v1034_v41 = vcombine.low %v1009_v36, %v1017_v38  ;;  %v1035_v42 = vcombine.high %v1009_v36, %v1017_v38 }
 0x25b   : > { %v1026_v43 = vrot.slane %v1018_v39, %v4038_v37  ;;  %v1042_v44 = vrot.slane %v1034_v41, %v4038_v37  ;;  %v1033_v47 = vrot.slane %v1019_v40, %v4038_v37  ;;  %v1049_v48 = vrot.slane %v1035_v42, %v4038_v37 }
 0x25d   : > { %v4080_v45 = vcombine.low %v1026_v43, %v1042_v44  ;;  %v4082_v46 = vcombine.high %v1026_v43, %v1042_v44  ;;  %v4092_v49 = vcombine.low %v1033_v47, %v1049_v48  ;;  %v4094_v50 = vcombine.high %v1033_v47, %v1049_v48 }
 0x25f   : > { %3263 = vmatpush3.xpose.msk.msra.mxu0 %vm1200_vm2, %v4080_v45  ;;  %3268 = vmatpush3.xpose.msk.msra.mxu1 %vm1200_vm2, %v4082_v46 }
 0x260   : > { %3272 = vmatprep.subr.mxu0 %v3702_v1  ;;  %3277 = vmatprep.subr.mxu1 %v3702_v1 }
 0x262   : > { %3265 = vmatmul.mubr.msk.f32.vlgmr.msra.gmra.mrb[0].mxu0 %vm1200_vm2, %v4058_v4  ;;  %3270 = vmatmul.mubr.msk.f32.vlgmr.msra.gmra.mrb[4].mxu1 %vm1200_vm2, %v4060_v5 }
 0x263   : > { %3273 = vmatpush3.xpose.msk.msra.mxu0 %vm1200_vm2, %v4092_v49  ;;  %3278 = vmatpush3.xpose.msk.msra.mxu1 %vm1200_vm2, %v4094_v50 }
 0x264   : > { %3274 = vmatprep.mubr.msk.f32.mxu0 %vm3701_vm0, %v3702_v1  ;;  %3279 = vmatprep.mubr.msk.f32.mxu1 %vm3701_vm0, %v3702_v1 }
 0x265   : > { %3282 = vmatprep.subr.mxu0 %v3702_v1  ;;  %3287 = vmatprep.subr.mxu1 %v3702_v1 }
 0x266   : > { %3275 = vmatmul.mubr.msk.f32.vlgmr.msra.gmra.mrb[2].mxu0 %vm1200_vm2, %v4062_v6  ;;  %3280 = vmatmul.mubr.msk.f32.vlgmr.msra.gmra.mrb[6].mxu1 %vm1200_vm2, %v4064_v7 }
 0x267   : > { %3284 = vmatprep.mubr.msk.f32.mxu0 %vm3701_vm0, %v3702_v1  ;;  %3289 = vmatprep.mubr.msk.f32.mxu1 %vm3701_vm0, %v3702_v1 }
 0x335   : > { %v1273_v53 = vpop.f32.mrb[0].mxu0  ;;  %v1349_v54 = vpop.f32.mrb[4].mxu1 }
 0x336   : > { %v3266_v55 = vpop.f32.mrb[1].mxu0  ;;  %v3271_v56 = vpop.f32.mrb[5].mxu1  ;;  %v1506_v57 = vsel %vm1505_vm3, %v1273_v53, -inf  ;;  %v1509_v58 = vsel %vm1505_vm3, %v1349_v54, -inf }
 0x337   : > { %1507 = vmax.xlane.f32.xlu1 %v1506_v57  ;;  %1510 = vmax.xlane.f32.xlu0 %v1509_v58 }
 0x339   : > { %v1425_v59 = vpop.f32.mrb[2].mxu0  ;;  %v1501_v60 = vpop.f32.mrb[6].mxu1 }
 0x33a   : > { %v3276_v61 = vpop.f32.mrb[3].mxu0  ;;  %v3281_v62 = vpop.f32.mrb[7].mxu1  ;;  %v1512_v63 = vsel %vm1505_vm3, %v1425_v59, -inf  ;;  %v1515_v9 = vsel %vm1505_vm3, %v1501_v60, -inf }
 0x33b   : > { %1513 = vmax.xlane.f32.xlu0 %v1512_v63 }
 0x348   : > { %1058 = vrot.lane.b32.xlu1 %v757_v3, %s3706_s29 }
 0x351   : > { %1055 = vrot.lane.b32.xlu0 %v757_v3, %s3704_s21 }
 0x36c   : > { %1516 = vmax.xlane.f32.xlu1 %v1515_v9 }
 0x37d   : > { %1061 = vrot.lane.b32.xlu1 %v757_v3, %s3703_s17 }
 0x3c4   : > { %v4128_v10 = vpop.xlane.xlu1 %1507  ;;  %v4130_v11 = vpop.xlane.xlu0 %1510 }
 0x3c5   : > { %v1518_v15 = vsub.f32 %v1273_v53, %v4128_v10  ;;  %v1519_v18 = vsub.f32 %v1349_v54, %v4130_v11 }
 0x3c7   : > { %v1522_v23 = vmul.f32 1.442695, %v1518_v15  ;;  %v1524_v29 = vmul.f32 1.442695, %v1519_v18  ;;  %v1847_v18 = vrot.slane %v4080_v45, 4 }
 0x3c8   : > { %v1059_v12 = vpop.permute.xlu1 %1058  ;;  %v4132_v13 = vpop.xlane.xlu0 %1513 }
 0x3c9   : > { %v1064_v16 = vcombine.low %v757_v3, %v1059_v12  ;;  %v1065_v17 = vcombine.high %v757_v3, %v1059_v12  ;;  %v1520_v24 = vsub.f32 %v1425_v59, %v4132_v13  ;;  %3495 = vpow2.f32 %v1522_v23 }
 0x3ca   : > { %3497 = vpow2.f32 %v1524_v29 }
 0x3cb   : > { %v1072_v25 = vrot.slane %v1064_v16, %v4032_v33  ;;  %v1079_v26 = vrot.slane %v1065_v17, %v4032_v33  ;;  %v1526_v36 = vmul.f32 1.442695, %v1520_v24 }
 0x3cc   : > { %v1056_v19 = vpop.permute.xlu0 %1055 }
 0x3cd   : > { %3499 = vpow2.f32 %v1526_v36 }
 0x3d3   : > { %v4154_v61 = vpop.eup %3495 }
 0x3d4   : > { %v4158_v9 = vpop.eup %3497  ;;  %v1530_v36 = vsel %vm1505_vm3, %v4154_v61, 0.0 }
 0x3d7   : > { %v4162_v12 = vpop.eup %3499 }
 0x3f9   : > { %v4134_v14 = vpop.xlane.xlu1 %1516 }
 0x3fa   : > { %v1521_v30 = vsub.f32 %v1501_v60, %v4134_v14 }
 0x3fc   : > { %v1528_v42 = vmul.f32 1.442695, %v1521_v30 }
 0x3fd   : > { %v1062_v20 = vpop.permute.xlu1 %1061 }
 0x3fe   : > { %v1080_v21 = vcombine.low %v1056_v19, %v1062_v20  ;;  %v1081_v22 = vcombine.high %v1056_v19, %v1062_v20  ;;  %3501 = vpow2.f32 %v1528_v42  ;;  %v1920_v19 = vrot.slane %v4082_v46, 4 }
 0x3ff   : > { %v1993_v20 = vrot.slane %v4092_v49, 4 }
 0x400   : > { %v1088_v27 = vrot.slane %v1080_v21, %v4032_v33  ;;  %v1095_v28 = vrot.slane %v1081_v22, %v4032_v33  ;;  %v2066_v21 = vrot.slane %v4094_v50, 4 }
 0x402   : > { %v1096_v31 = vcombine.low %v1072_v25, %v1088_v27  ;;  %v1097_v32 = vcombine.high %v1072_v25, %v1088_v27  ;;  %v1112_v34 = vcombine.low %v1079_v26, %v1095_v28  ;;  %v1113_v35 = vcombine.high %v1079_v26, %v1095_v28 }
 0x404   : > { %v1104_v38 = vrot.slane %v1096_v31, %v4038_v37  ;;  %v1111_v39 = vrot.slane %v1097_v32, %v4038_v37  ;;  %v1120_v40 = vrot.slane %v1112_v34, %v4038_v37  ;;  %v1127_v41 = vrot.slane %v1113_v35, %v4038_v37 }
 0x406   : > { %v1132_v43 = vcombine.low %v1104_v38, %v1111_v39  ;;  %v3129_v44 = vcombine.high %v1104_v38, %v1111_v39  ;;  %v1148_v47 = vcombine.low %v1120_v40, %v1127_v41  ;;  %v3130_v48 = vcombine.high %v1120_v40, %v1127_v41 }
 0x407   : > { %v1536_v38 = vsel %vm1505_vm3, %v4162_v12, 0.0  ;;  %v1533_v40 = vsel %vm1505_vm3, %v4158_v9, 0.0 }
 0x408   : > { %v1139_v51 = vrot.slane %v1132_v43, %v4032_v33  ;;  %v1147_v52 = vrot.slane %v3129_v44, %v4032_v33  ;;  %v1155_v53 = vrot.slane %v1148_v47, %v4032_v33  ;;  %v1163_v54 = vrot.slane %v3130_v48, %v4032_v33  ;;  %v4174_v17 = vpop.eup %3501 }
 0x409   : > { %v1539_v41 = vsel %vm1505_vm3, %v4174_v17, 0.0 }
 0x40a   : > { %v1164_v55 = vcombine.low %v1139_v51, %v1147_v52  ;;  %v1165_v56 = vcombine.high %v1139_v51, %v1147_v52  ;;  %v1180_v57 = vcombine.low %v1155_v53, %v1163_v54  ;;  %v1181_v58 = vcombine.high %v1155_v53, %v1163_v54 }
 0x40c   : > { %v1172_v59 = vrot.slane %v1164_v55, %v4038_v37  ;;  %v1188_v60 = vrot.slane %v1180_v57, %v4038_v37  ;;  %v1179_v62 = vrot.slane %v1165_v56, %v4038_v37  ;;  %v1195_v63 = vrot.slane %v1181_v58, %v4038_v37 }
 0x40e   : > { %v1196_v2 = vcombine.low %v1172_v59, %v1188_v60  ;;  %v1197_v3 = vcombine.high %v1172_v59, %v1188_v60  ;;  %v4168_v15 = vcombine.low %v1179_v62, %v1195_v63  ;;  %v4170_v16 = vcombine.high %v1179_v62, %v1195_v63 }
 0x410   : > { %3283 = vmatpush3.msk.msra.mxu0 %vm1545_vm4, %v1196_v2  ;;  %3288 = vmatpush3.msk.msra.mxu1 %vm1545_vm4, %v1197_v3  ;;  %v2203_v45 = vrot.slane %v1196_v2, 4  ;;  %v2279_v46 = vrot.slane %v1197_v3, 4 }
 0x411   : > { %3285 = vmatmul.mubr.msk.f32.vlgmr.msra.gmra.mrb[4].mxu0 %vm1505_vm3, %v4154_v61  ;;  %3290 = vmatmul.mubr.msk.f32.vlgmr.msra.gmra.mrb[8].mxu1 %vm1505_vm3, %v4158_v9 }
 0x412   : > { %3292 = vmatprep.subr.mxu0 %v3702_v1  ;;  %3297 = vmatprep.subr.mxu1 %v3702_v1 }
 0x413   : > { %3293 = vmatpush3.msk.msra.mxu0 %vm1545_vm4, %v4168_v15  ;;  %3298 = vmatpush3.msk.msra.mxu1 %vm1545_vm4, %v4170_v16 }
 0x414   : > { %3294 = vmatprep.mubr.msk.f32.mxu0 %vm3701_vm0, %v3702_v1  ;;  %3299 = vmatprep.mubr.msk.f32.mxu1 %vm3701_vm0, %v3702_v1 }
 0x415   : > { %3295 = vmatmul.mubr.msk.f32.vlgmr.msra.gmra.mrb[6].mxu0 %vm1505_vm3, %v4162_v12  ;;  %3300 = vmatmul.mubr.msk.f32.vlgmr.msra.gmra.mrb[10].mxu1 %vm1505_vm3, %v4174_v17 }
 0x416   : > { %3302 = vmatprep.subr.mxu0 %v3702_v1  ;;  %3307 = vmatprep.subr.mxu1 %v3702_v1 }
 0x417   : > { %3304 = vmatprep.mubr.msk.f32.mxu0 %vm3701_vm0, %v3702_v1  ;;  %3309 = vmatprep.mubr.msk.f32.mxu1 %vm3701_vm0, %v3702_v1 }
 0x41a   : > { %3303 = vmatpush3.xpose.msk.msra.mxu0 %vm1200_vm2, %v1847_v18  ;;  %3308 = vmatpush3.xpose.msk.msra.mxu1 %vm1200_vm2, %v1920_v19  ;;  %v2355_v18 = vrot.slane %v4168_v15, 4 }
 0x41b   : > { %3312 = vmatprep.subr.mxu0 %v3702_v1  ;;  %3317 = vmatprep.subr.mxu1 %v3702_v1 }
 0x41d   : > { %3305 = vmatmul.mubr.msk.f32.vlgmr.msra.gmra.mrb[8].mxu0 %vm1200_vm2, %v4058_v4  ;;  %3310 = vmatmul.mubr.msk.f32.vlgmr.msra.gmra.mrb[12].mxu1 %vm1200_vm2, %v4060_v5 }
 0x41e   : > { %3313 = vmatpush3.xpose.msk.msra.mxu0 %vm1200_vm2, %v1993_v20  ;;  %3318 = vmatpush3.xpose.msk.msra.mxu1 %vm1200_vm2, %v2066_v21 }
 0x41f   : > { %3314 = vmatprep.mubr.msk.f32.mxu0 %vm3701_vm0, %v3702_v1  ;;  %3319 = vmatprep.mubr.msk.f32.mxu1 %vm3701_vm0, %v3702_v1 }
 0x420   : > { %3322 = vmatprep.subr.mxu0 %v3702_v1  ;;  %3327 = vmatprep.subr.mxu1 %v3702_v1 }
 0x421   : > { %3315 = vmatmul.mubr.msk.f32.vlgmr.msra.gmra.mrb[10].mxu0 %vm1200_vm2, %v4062_v6  ;;  %3320 = vmatmul.mubr.msk.f32.vlgmr.msra.gmra.mrb[14].mxu1 %vm1200_vm2, %v4064_v7 }
 0x422   : > { %3323 = vmatpush3.msk.msra.mxu0 %vm1545_vm4, %v2203_v45  ;;  %3328 = vmatpush3.msk.msra.mxu1 %vm1545_vm4, %v2279_v46 }
 0x423   : > { %3324 = vmatprep.mubr.msk.f32.mxu0 %vm3701_vm0, %v3702_v1  ;;  %3329 = vmatprep.mubr.msk.f32.mxu1 %vm3701_vm0, %v3702_v1 }
 0x424   : > { %3332 = vmatprep.subr.mxu0 %v3702_v1  ;;  %3337 = vmatprep.subr.mxu1 %v3702_v1 }
 0x4e4   : > { %v4226_v4 = vpop.f32.mrb[4].mxu0  ;;  %v4228_v5 = vpop.f32.mrb[8].mxu1 }
 0x4e5   : > { %v3286_v6 = vpop.f32.mrb[5].mxu0  ;;  %v3291_v7 = vpop.f32.mrb[9].mxu1 }
 0x4e8   : > { %v4230_v49 = vpop.f32.mrb[6].mxu0  ;;  %v4232_v50 = vpop.f32.mrb[10].mxu1 }
 0x4e9   : > { %v3296_v22 = vpop.f32.mrb[7].mxu0  ;;  %v3301_v23 = vpop.f32.mrb[11].mxu1 }
 0x4f0   : > { %v1916_v24 = vpop.f32.mrb[8].mxu0  ;;  %v1989_v25 = vpop.f32.mrb[12].mxu1 }
 0x4f1   : > { %v3306_v26 = vpop.f32.mrb[9].mxu0  ;;  %v3311_v27 = vpop.f32.mrb[13].mxu1  ;;  %v2139_v28 = vsel %vm1505_vm3, %v1916_v24, -inf  ;;  %v2142_v29 = vsel %vm1505_vm3, %v1989_v25, -inf }
 0x4f2   : > { %2140 = vmax.xlane.f32.xlu0 %v2139_v28  ;;  %2143 = vmax.xlane.f32.xlu1 %v2142_v29 }
 0x4f4   : > { %v2062_v30 = vpop.f32.mrb[10].mxu0  ;;  %v2135_v31 = vpop.f32.mrb[14].mxu1 }
 0x4f5   : > { %v3316_v32 = vpop.f32.mrb[11].mxu0  ;;  %v3321_v34 = vpop.f32.mrb[15].mxu1  ;;  %v2145_v35 = vsel %vm1505_vm3, %v2062_v30, -inf  ;;  %v2148_v39 = vsel %vm1505_vm3, %v2135_v31, -inf }
 0x4f6   : > { %2146 = vmax.xlane.f32.xlu0 %v2145_v35  ;;  %1531 = vadd.xlane.f32.xlu1 %v1530_v36 }
 0x4fa   : > { %1537 = vadd.xlane.f32.xlu1 %v1536_v38  ;;  %2149 = vmax.xlane.f32.xlu0 %v2148_v39 }
 0x4fe   : > { %1534 = vadd.xlane.f32.xlu0 %v1533_v40 }
 0x502   : > { %1540 = vadd.xlane.f32.xlu0 %v1539_v41 }
 0x57f   : > { %v2141_v42 = vpop.xlane.xlu0 %2140  ;;  %v2144_v43 = vpop.xlane.xlu1 %2143 }
 0x580   : > { %v2151_v44 = vmax.f32 %v4128_v10, %v2141_v42  ;;  %v2152_v47 = vmax.f32 %v4130_v11, %v2144_v43 }
 0x582   : > { %v2155_v48 = vsub.f32 %v4128_v10, %v2151_v44  ;;  %v2167_v51 = vsub.f32 %v1916_v24, %v2151_v44  ;;  %v2156_v52 = vsub.f32 %v4130_v11, %v2152_v47  ;;  %v2168_v53 = vsub.f32 %v1989_v25, %v2152_v47  ;;  %v2672_v24 = vld [vmem:[%s4425_s6] sm:$0xff]  ;;  %v2673_v25 = vld [vmem:[%s4425_s6 + $0x8] sm:$0xff] }
 0x583   : > { %v2147_v54 = vpop.xlane.xlu0 %2146  ;;  %v3396_v26 = vpack.c.bf16 %v2673_v25, %v2672_v24 }
 0x584   : > { %v2159_v55 = vmul.f32 1.442695, %v2155_v48  ;;  %v2171_v56 = vmul.f32 1.442695, %v2167_v51  ;;  %v2161_v57 = vmul.f32 1.442695, %v2156_v52  ;;  %v2153_v58 = vmax.f32 %v4132_v13, %v2147_v54 }
 0x585   : > { %v2173_v59 = vmul.f32 1.442695, %v2168_v53 }
 0x586   : > { %3503 = vpow2.f32 %v2159_v55  ;;  %v2157_v60 = vsub.f32 %v4132_v13, %v2153_v58  ;;  %v2169_v61 = vsub.f32 %v2062_v30, %v2153_v58 }
 0x587   : > { %3505 = vpow2.f32 %v2171_v56  ;;  %v2150_v62 = vpop.xlane.xlu0 %2149 }
 0x588   : > { %3507 = vpow2.f32 %v2161_v57  ;;  %v2163_v63 = vmul.f32 1.442695, %v2157_v60  ;;  %v2175_v10 = vmul.f32 1.442695, %v2169_v61  ;;  %v2154_v2 = vmax.f32 %v4134_v14, %v2150_v62 }
 0x589   : > { %3509 = vpow2.f32 %v2173_v59 }
 0x58a   : > { %3511 = vpow2.f32 %v2163_v63  ;;  %v2158_v11 = vsub.f32 %v4134_v14, %v2154_v2  ;;  %v2170_v3 = vsub.f32 %v2135_v31, %v2154_v2  ;;  %v2431_v14 = vrot.slane %v4170_v16, 4 }
 0x58b   : > { %3513 = vpow2.f32 %v2175_v10  ;;  %v1535_v27 = vpop.xlane.xlu0 %1534 }
 0x58c   : > { %v2165_v9 = vmul.f32 1.442695, %v2158_v11  ;;  %v2177_v12 = vmul.f32 1.442695, %v2170_v3 }
 0x58e   : > { %3515 = vpow2.f32 %v2165_v9 }
 0x58f   : > { %3517 = vpow2.f32 %v2177_v12  ;;  %v1541_v29 = vpop.xlane.xlu0 %1540 }
 0x590   : > { %v3504_v17 = vpop.eup %3503 }
 0x591   : > { %v3506_v13 = vpop.eup %3505  ;;  %v2199_v19 = vmul.f32 %v3504_v17, %v4226_v4 }
 0x592   : > { %v3508_v20 = vpop.eup %3507  ;;  %3325 = vmatmul.mubr.msk.f32.vlgmr.msra.gmra.mrb[12].mxu0 %vm1505_vm3, %v3506_v13  ;;  %v2183_v21 = vsel %vm1505_vm3, %v3506_v13, 0.0 }
 0x593   : > { %v3510_v45 = vpop.eup %3509  ;;  %3333 = vmatpush3.msk.msra.mxu0 %vm1545_vm4, %v2355_v18  ;;  %2184 = vadd.xlane.f32.xlu1 %v2183_v21  ;;  %v2200_v46 = vmul.f32 %v3508_v20, %v4228_v5  ;;  %v2180_v34 = vmul.f32 %v3508_v20, %v1535_v27 }
 0x594   : > { %v3512_v6 = vpop.eup %3511  ;;  %3330 = vmatmul.mubr.msk.f32.vlgmr.msra.gmra.mrb[16].mxu1 %vm1505_vm3, %v3510_v45  ;;  %v2186_v15 = vsel %vm1505_vm3, %v3510_v45, 0.0  ;;  %3334 = vmatprep.mubr.msk.f32.mxu0 %vm3701_vm0, %v3702_v1 }
 0x595   : > { %v3514_v4 = vpop.eup %3513  ;;  %3338 = vmatpush3.msk.msra.mxu1 %vm1545_vm4, %v2431_v14  ;;  %2187 = vadd.xlane.f32.xlu0 %v2186_v15  ;;  %v2201_v7 = vmul.f32 %v3512_v6, %v4230_v49  ;;  %v2674_v15 = vld [vmem:[%s4425_s6 + $0x10] sm:$0xff] }
 0x596   : > { %3335 = vmatmul.mubr.msk.f32.vlgmr.msra.gmra.mrb[14].mxu0 %vm1505_vm3, %v3514_v4  ;;  %v2189_v16 = vsel %vm1505_vm3, %v3514_v4, 0.0  ;;  %3339 = vmatprep.mubr.msk.f32.mxu1 %vm3701_vm0, %v3702_v1  ;;  %v2675_v4 = vld [vmem:[%s4425_s6 + $0x18] sm:$0xff] }
 0x597   : > { %2190 = vadd.xlane.f32.xlu1 %v2189_v16  ;;  %3395 = vmatprep.subr.bf16.mxu0 %v3700_v0 }
 0x598   : > { %v3516_v5 = vpop.eup %3515  ;;  %3350 = vmatprep.mubr.msk.f32.mxu0 %vm3701_vm0, %v3702_v1  ;;  %3401 = vmatprep.subr.bf16.mxu1 %v3700_v0 }
 0x599   : > { %v3518_v22 = vpop.eup %3517  ;;  %v2202_v23 = vmul.f32 %v3516_v5, %v4232_v50  ;;  %3397 = vmatpush3.bf16.msra.mxu0 %v3396_v26  ;;  %v1532_v50 = vpop.xlane.xlu1 %1531  ;;  %v2182_v42 = vmul.f32 %v3516_v5, %v1541_v29 }
 0x59a   : > { %3340 = vmatmul.mubr.msk.f32.vlgmr.msra.gmra.mrb[18].mxu1 %vm1505_vm3, %v3518_v22  ;;  %v2192_v49 = vsel %vm1505_vm3, %v3518_v22, 0.0  ;;  %3398 = vmatprep.subr.bf16.mxu0 %v3700_v0  ;;  %v2179_v31 = vmul.f32 %v3504_v17, %v1532_v50 }
 0x59b   : > { %2193 = vadd.xlane.f32.xlu0 %v2192_v49  ;;  %3361 = vmatprep.mubr.msk.f32.mxu1 %vm3701_vm0, %v3702_v1 }
 0x59d   : > { %v1538_v28 = vpop.xlane.xlu1 %1537 }
 0x59e   : > { %v2181_v38 = vmul.f32 %v3512_v6, %v1538_v28 }
 0x620   : > { %v2185_v30 = vpop.xlane.xlu1 %2184 }
 0x621   : > { %v2195_v35 = vadd.f32 %v2185_v30, %v2179_v31 }
 0x622   : > { %v2188_v32 = vpop.xlane.xlu0 %2187 }
 0x623   : > { %v2196_v39 = vadd.f32 %v2188_v32, %v2180_v34  ;;  %3519 = vrcp.f32 %v2195_v35 }
 0x624   : > { %v2191_v36 = vpop.xlane.xlu1 %2190 }
 0x625   : > { %v2197_v40 = vadd.f32 %v2191_v36, %v2181_v38  ;;  %3521 = vrcp.f32 %v2196_v39 }
 0x627   : > { %3523 = vrcp.f32 %v2197_v40 }
 0x628   : > { %v2194_v41 = vpop.xlane.xlu0 %2193 }
 0x629   : > { %v2198_v43 = vadd.f32 %v2194_v41, %v2182_v42 }
 0x62b   : > { %3525 = vrcp.f32 %v2198_v43 }
 0x62d   : > { %v3520_v51 = vpop.eup %3519 }
 0x62f   : > { %v3522_v56 = vpop.eup %3521 }
 0x631   : > { %v3524_v61 = vpop.eup %3523 }
 0x635   : > { %v3526_v9 = vpop.eup %3525 }
 0x665   : > { %v2275_v44 = vpop.f32.mrb[12].mxu0 }
 0x666   : > { %v2507_v47 = vadd.f32 %v2275_v44, %v2199_v19  ;;  %v3326_v48 = vpop.f32.mrb[13].mxu0 }
 0x667   : > { %v2351_v52 = vpop.f32.mrb[16].mxu1 }
 0x668   : > { %v2515_v53 = vmul.f32 %v3520_v51, %v2507_v47  ;;  %v2508_v54 = vadd.f32 %v2351_v52, %v2200_v46  ;;  %v3331_v55 = vpop.f32.mrb[17].mxu1 }
 0x669   : > { %v2427_v57 = vpop.f32.mrb[14].mxu0 }
 0x66a   : > { %v2516_v58 = vmul.f32 %v3522_v56, %v2508_v54  ;;  %v2509_v59 = vadd.f32 %v2427_v57, %v2201_v7  ;;  %v3336_v60 = vpop.f32.mrb[15].mxu0 }
 0x66c   : > { %v2517_v62 = vmul.f32 %v3524_v61, %v2509_v59 }
 0x66d   : > { %v2503_v63 = vpop.f32.mrb[18].mxu1 }
 0x66e   : > { %v2519_v10 = vcombine.low %v2515_v53, %v2517_v62  ;;  %v2520_v2 = vcombine.high %v2515_v53, %v2517_v62  ;;  %v2510_v11 = vadd.f32 %v2503_v63, %v2202_v23  ;;  %v3341_v3 = vpop.f32.mrb[19].mxu1  ;;  %v3399_v23 = vpack.c.bf16 %v2675_v4, %v2674_v15  ;;  %v2788_v63 = vld [vmem:[#allocation7 + $0x8] sm:$0xff]  ;;  %v3167_v15 = vld [vmem:[%s4431_s12] ss:$0 sm:$0xff] }
 0x670   : > { %v2518_v12 = vmul.f32 %v3526_v9, %v2510_v11  ;;  %v2527_v18 = vrot.slane %v2519_v10, %v4032_v33  ;;  %v2534_v19 = vrot.slane %v2520_v2, %v4032_v33  ;;  %3400 = vmatpush3.bf16.msra.mxu0 %v3399_v23  ;;  %v2789_v2 = vld [vmem:[#allocation7 + $0x10] sm:$0xff]  ;;  %v2790_v11 = vld [vmem:[#allocation7 + $0x18] sm:$0xff]  ;;  %v2873_v9 = vld [vmem:[%s4429_s10 + $0x8] sm:$0xff] }
 0x671   : > { %3407 = vmatprep.subr.bf16.mxu0 %v3700_v0  ;;  %v3405_v3 = vpack.c.bf16 %v2790_v11, %v2789_v2 }
 0x672   : > { %v2535_v17 = vcombine.low %v2516_v58, %v2518_v12  ;;  %v2536_v13 = vcombine.high %v2516_v58, %v2518_v12  ;;  %v2874_v12 = vld [vmem:[%s4429_s10 + $0x10] sm:$0xff] }
 0x674   : > { %v2543_v20 = vrot.slane %v2535_v17, %v4032_v33  ;;  %v2550_v21 = vrot.slane %v2536_v13, %v4032_v33  ;;  %v2875_v13 = vld [vmem:[%s4429_s10 + $0x18] sm:$0xff] }
 0x676   : > { %v2551_v45 = vcombine.low %v2527_v18, %v2543_v20  ;;  %v2552_v14 = vcombine.high %v2527_v18, %v2543_v20  ;;  %v2567_v46 = vcombine.low %v2534_v19, %v2550_v21  ;;  %v2568_v6 = vcombine.high %v2534_v19, %v2550_v21  ;;  %v2876_v19 = vld [vmem:[%s4429_s10 + $0x20] sm:$0xff]  ;;  %v2877_v20 = vld [vmem:[%s4429_s10 + $0x28] sm:$0xff] }
 0x677   : > { %v3411_v18 = vpack.c.bf16 %v2875_v13, %v2874_v12  ;;  %v3414_v21 = vpack.c.bf16 %v2877_v20, %v2876_v19 }
 0x678   : > { %v2559_v7 = vrot.slane %v2551_v45, %v4038_v37  ;;  %v2566_v16 = vrot.slane %v2552_v14, %v4038_v37  ;;  %v2575_v5 = vrot.slane %v2567_v46, %v4038_v37  ;;  %v2582_v22 = vrot.slane %v2568_v6, %v4038_v37 }
 0x67a   : > { %v2587_v49 = vcombine.low %v2559_v7, %v2566_v16  ;;  %v3163_v24 = vcombine.high %v2559_v7, %v2566_v16  ;;  %v2603_v25 = vcombine.low %v2575_v5, %v2582_v22  ;;  %v3164_v26 = vcombine.high %v2575_v5, %v2582_v22  ;;  %v3168_v7 = vld [vmem:[%s4476_s30] ss:$0 sm:$0xff]  ;;  %v2879_v22 = vld [vmem:[%s4429_s10 + $0x38] sm:$0xff] }
 0x67c   : > { %v2594_v50 = vrot.slane %v2587_v49, %v4032_v33  ;;  %v2602_v27 = vrot.slane %v3163_v24, %v4032_v33  ;;  %v2610_v28 = vrot.slane %v2603_v25, %v4032_v33  ;;  %v2618_v29 = vrot.slane %v3164_v26, %v4032_v33  ;;  %v3169_v49 = vld [vmem:[%s4477_s19] ss:$0 sm:$0xff]  ;;  %s4482_s19 = sld [smem:[#allocation26_spill]] }
 0x67e   : > { %v2620_v30 = vcombine.high %v2594_v50, %v2602_v27  ;;  %v2636_v31 = vcombine.high %v2610_v28, %v2618_v29  ;;  %v2619_v32 = vcombine.low %v2594_v50, %v2602_v27  ;;  %v2635_v34 = vcombine.low %v2610_v28, %v2618_v29  ;;  %v3171_v27 = vld [vmem:[%s4478_s9] ss:$0 sm:$0xff]  ;;  %s3619_s9 = scalar_lea.vmem %s4376_s20, 128 }
 0x67f   : > { %p3620_p10 = scmp.ne.s32.totalorder %s4376_s20, %s3619_s9 }
 0x680   : > { %v2634_v35 = vrot.slane %v2620_v30, %v4038_v37  ;;  %v2650_v36 = vrot.slane %v2636_v31, %v4038_v37  ;;  %v2627_v38 = vrot.slane %v2619_v32, %v4038_v37  ;;  %v2643_v39 = vrot.slane %v2635_v34, %v4038_v37  ;;  %v3165_v37 = vld [vmem:[%s4426_s7] ss:$0 sm:$0xff] }
 0x682   : > { %v2653_v40 = vcombine.low %v2634_v35, %v2650_v36  ;;  %v2652_v41 = vcombine.high %v2627_v38, %v2643_v39  ;;  %v2654_v42 = vcombine.high %v2634_v35, %v2650_v36  ;;  %v2651_v43 = vcombine.low %v2627_v38, %v2643_v39  ;;  %s4374_s29 = scalar_lea.hbm %s4482_s19, %s3176_s11 }
 0x684   : > { %2660 = vrot.lane.b32.xlu0 %v2653_v40, %s3709_s27  ;;  %2656 = vrot.lane.b32.xlu1 %v2652_v41, %s3710_s18  ;;  %s4479_s27 = sld [smem:[#allocation18_spill]]  ;;  %s3625_s18 = scalar_lea.vmem %s3624_s23, 256 }
 0x685   : > { %p3627_p2 = scmp.lt.s32.totalorder %s3625_s18, %s3619_s9 }
 0x687   : > { %p3628_p5 = por %p3627_p2, %p3626_p9 }
 0x688   : > { %2664 = vrot.lane.b32.xlu1 %v2654_v42, %s3711_s14 }
 0x68a   : > { %p4483_p13 = scmp.ne.s32.totalorder %s4479_s27, 0 }
 0x68c   : > { %p3621_p3 = pnand %p3620_p10, %p4483_p13 }
 0x68e   : > { %p3622_p7 = pneg %p3621_p3 }
 0x690   : > { %p3629_p1 = pnand %p3628_p5, %p3622_p7 }
 0x6f6   : > { %v2657_v33 = vpop.permute.xlu1 %2656  ;;  %v2661_v44 = vpop.permute.xlu0 %2660 }
 0x6f7   : > { %v2667_v47 = vsel %vm1200_vm2, %v2651_v43, %v2657_v33  ;;  %v3173_v33 = vld [vmem:[%s4480_s26] ss:$0 sm:$0xff] }
 0x6f8   : > { %v2669_v51 = vsel %vm2668_vm5, %v2667_v47, %v2661_v44  ;;  %v3174_v47 = vld [vmem:[%s4481_s13] ss:$0 sm:$0xff] }
 0x6fa   : > { %v2665_v48 = vpop.permute.xlu1 %2664 }
 0x6fb   : > { %v2671_v52 = vsel %vm2670_vm6, %v2669_v51, %v2665_v48 }
 0x6fc   : > { %3351 = vmatmul.mubr.msk.f32.vlgmr.msra.gmra.mrb[16].mxu0 %vm602_vm1, %v2671_v52 }
 0x6fd   : > { %3380 = vmatprep.mubr.msk.f32.mxu0 %vm3701_vm0, %v3702_v1  ;;  %v2787_v1 = vld [vmem:[#allocation7] sm:$0xff] }
 0x6fe   : > { %v3402_v10 = vpack.c.bf16 %v2788_v63, %v2787_v1 }
 0x700   : > { %3403 = vmatpush3.bf16.msra.mxu1 %v3402_v10 }
 0x701   : > { %3404 = vmatprep.subr.bf16.mxu1 %v3700_v0 }
 0x704   : > { %3406 = vmatpush3.bf16.msra.mxu1 %v3405_v3 }
 0x7cf   : > { %v2752_v53 = vpop.f32.mrb[16].mxu0 }
 0x7d0   : > { %v2753_v54 = vadd.f32 %v3165_v37, %v2752_v53  ;;  %v3352_v55 = vpop.f32.mrb[17].mxu0 }
 0x7d2   : > { %v2756_v56 = vadd.f32 %v2753_v54, %v4002_v8  ;;  %v2872_v8 = vld [vmem:[%s4429_s10] sm:$0xff] }
 0x7d3   : > { %v3408_v17 = vpack.c.bf16 %v2873_v9, %v2872_v8 }
 0x7d4   : > { %v2757_v57 = vsel %vm602_vm1, %v2756_v56, 0.0 }
 0x7d5   : > { %2758 = vadd.xlane.f32.xlu1 %v2757_v57  ;;  %3409 = vmatpush3.bf16.msra.mxu0 %v3408_v17 }
 0x7d6   : > { %3410 = vmatprep.subr.bf16.mxu0 %v3700_v0 }
 0x7d9   : > { %3412 = vmatpush3.bf16.msra.mxu0 %v3411_v18 }
 0x7da   : > { %3413 = vmatprep.subr.bf16.mxu0 %v3700_v0 }
 0x7dd   : > { %3415 = vmatpush3.bf16.msra.mxu0 %v3414_v21 }
 0x7de   : > { %3416 = vmatprep.subr.bf16.mxu0 %v3700_v0  ;;  %v2878_v0 = vld [vmem:[%s4429_s10 + $0x30] sm:$0xff] }
 0x7df   : > { %v3417_v23 = vpack.c.bf16 %v2879_v22, %v2878_v0 }
 0x7e1   : > { %3418 = vmatpush3.bf16.msra.mxu0 %v3417_v23 }
 0x862   : > { %v2759_v58 = vpop.xlane.xlu1 %2758 }
 0x863   : > { %v2761_v59 = vmul.f32 0.03125, %v2759_v58 }
 0x865   : > { %v2762_v60 = vsub.f32 %v2756_v56, %v2761_v59 }
 0x867   : > { %v2763_v61 = vmul.f32 %v2762_v60, %v2762_v60 }
 0x869   : > { %v2764_v62 = vsel %vm602_vm1, %v2763_v61, 0.0 }
 0x86a   : > { %2765 = vadd.xlane.f32.xlu0 %v2764_v62 }
 0x8f7   : > { %v2766_v45 = vpop.xlane.xlu0 %2765 }
 0x8f8   : > { %v2767_v14 = vmul.f32 0.03125, %v2766_v45 }
 0x8fa   : > { %v2768_v46 = vadd.f32 1e-05, %v2767_v14 }
 0x8fc   : > { %3527 = vrsqrt.f32 %v2768_v46 }
 0x906   : > { %v3528_v6 = vpop.eup %3527 }
 0x907   : > { %v2770_v4 = vmul.f32 %v3528_v6, %v2762_v60 }
 0x909   : > { %v2778_v16 = vmul.f32 %v3167_v15, %v2770_v4 }
 0x90b   : > { %v2786_v5 = vadd.f32 %v3168_v7, %v2778_v16 }
 0x90d   : > { %3362 = vmatmul.mubr.msk.f32.vlgmr.msra.gmra.mrb[20].mxu1 %vm602_vm1, %v2786_v5 }
 0x9e0   : > { %v2867_v24 = vpop.f32.mrb[20].mxu1 }
 0x9e1   : > { %v2868_v25 = vadd.f32 %v3169_v49, %v2867_v24  ;;  %v3363_v26 = vpop.f32.mrb[21].mxu1 }
 0x9e3   : > { %v2871_v50 = vmax.f32 %v2868_v25, 0.0 }
 0x9e5   : > { %3381 = vmatmul.mubr.msk.f32.vlgmr.msra.gmra.mrb[18].mxu0 %vm2887_vm7, %v2871_v50 }
 0xab8   : > { %v2957_v28 = vpop.f32.mrb[18].mxu0 }
 0xab9   : > { %v2958_v29 = vadd.f32 %v3171_v27, %v2957_v28  ;;  %v3382_v30 = vpop.f32.mrb[19].mxu0 }
 0xabb   : > { %v2961_v31 = vadd.f32 %v2958_v29, %v2786_v5 }
 0xabd   : > { %v2962_v32 = vsel %vm602_vm1, %v2961_v31, 0.0 }
 0xabe   : > { %2963 = vadd.xlane.f32.xlu0 %v2962_v32 }
 0xb4b   : > { %v2964_v34 = vpop.xlane.xlu0 %2963 }
 0xb4c   : > { %v2965_v35 = vmul.f32 0.03125, %v2964_v34 }
 0xb4e   : > { %v2966_v36 = vsub.f32 %v2961_v31, %v2965_v35 }
 0xb50   : > { %v2967_v38 = vmul.f32 %v2966_v36, %v2966_v36 }
 0xb52   : > { %v2968_v39 = vsel %vm602_vm1, %v2967_v38, 0.0 }
 0xb53   : > { %2969 = vadd.xlane.f32.xlu1 %v2968_v39 }
 0xbe0   : > { %v2970_v40 = vpop.xlane.xlu1 %2969 }
 0xbe1   : > { %v2971_v41 = vmul.f32 0.03125, %v2970_v40 }
 0xbe3   : > { %v2972_v42 = vadd.f32 1e-05, %v2971_v41 }
 0xbe5   : > { %3529 = vrsqrt.f32 %v2972_v42 }
 0xbef   : > { %v3530_v43 = vpop.eup %3529 }
 0xbf0   : > { %v2974_v44 = vmul.f32 %v3530_v43, %v2966_v36 }
 0xbf2   : > { %v2982_v48 = vmul.f32 %v3173_v33, %v2974_v44 }
 0xbf4   : > { %v2990_v51 = vadd.f32 %v3174_v47, %v2982_v48 }
 0xbf6   : > { %2991 = vst.msk [vmem:[%s587_s0] sm:$0xff] %vm602_vm1, %v2990_v51 }
 0xbf7   : > { %3632 = shalt.err (!%p3629_p1)
}
 0xbf8   : > { %s3633_s8 = scalar_lea.hbm %s4374_s29, 128  ;;  %s3637_s28 = scalar_lea.hbm %s4482_s19, 256 }
 0xbf9   : > { %p3634_p6 = scmp.ne.s32.totalorder %s4374_s29, %s3633_s8  ;;  %p3638_p12 = scmp.lt.u32.totalorder %s4374_s29, %s4482_s19 }
 0xbfa   : > { %p3639_p11 = scmp.lt.u32.totalorder %s3637_s28, %s3633_s8  ;;  %p3641_p10 = scmp.lt.u32.totalorder %s3633_s8, %s4374_s29 }
 0xbfb   : > { %p3635_p8 = pnand %p3634_p6, %p4483_p13 }
 0xbfc   : > { %p3640_p0 = por %p3639_p11, %p3638_p12 }
 0xbfd   : > { %p3636_p4 = pneg %p3635_p8 }
 0xbfe   : > { %p3642_p3 = por %p3641_p10, %p3640_p0 }
 0xc00   : > { %p3643_p7 = pnand %p3642_p3, %p3636_p4 }
 0xc02   : > { %3646 = shalt.err (!%p3643_p7)
}
 0xc03   : > { %3427 = dma.vmem_to_hbm [thread:$0]  (%p4483_p13), %s4376_s20, 128, %s4374_s29, %s2993_s16  }
 0xc04 PF: > { %s4484_s11 = sld [smem:[#allocation13_spill]]  ;;  %s4485_s0 = sld [smem:[#allocation15_spill]] }
 0xc05   : > { %p4487_p2 = scmp.ge.s32.totalorder %s3693_s24, 2 }
 0xc0a   : > { %s3018_s17 = sand.u32 1, %s4484_s11   ;;  %p4486_p9 = scmp.ne.s32.totalorder %s4485_s0, 0 }
 0xc0b   : > { %s3019_s21 = scalar_lea.sflag [#allocation4], %s3018_s17 }
 0xc0c   : > { %p3441_p5 = pnand %p4487_p2, %p4486_p9 }
 0xc0e   : > { %3676 = dma.done.wait (!%p3441_p5), %s3019_s21, 128  }
 0xc0f   : > { %3678 = vsyncadd (!%p3441_p5), %s3019_s21, 4294967168  ;;  %s4488_s24 = sld [smem:[#allocation16_spill]]  ;;  %s4489_s9 = sld [smem:[#allocation14_spill]] }
 0xc10   : > { %s4490_s23 = sld [smem:[#allocation17_spill]]  ;;  %s4491_s21 = smov %s3685_s22 }
 0xc15   : > { %p32_p1 = scmp.ge.s32.totalorder %s4488_s24, 4   ;;  %s4492_s22 = smov %s4489_s9 }
 0xc17   :  { %34 = sbr.rel (!%p32_p1) target bundleno = 16 (0x10), region = 146 }
 0xc1e   :  { %3024 = vsyncpa [#allocation3], 1 }
 0xc1f   :  { %3026 = vsyncpa [#allocation3 + $0x1], 1 }
 0xc20   :  { %3027 = vsyncpa [#allocation6], 1 }
 0xc21   :  { %3029 = vsyncpa [#allocation6 + $0x1], 1 }
 0xc22   :  { %3030 = vsyncpa [#allocation4], 1 }
 0xc23   :  { %3032 = vsyncpa [#allocation4 + $0x1], 1 }

</bundles_post_ra>
